<compile_context>
chip_gen: v5e
topology: v5e:2x2
jax: 0.10.0
libtpu: 0.0.40
codegen_flags: <defaults>
</compile_context>

<pallas_src>
import numpy as np
import jax
import jax.numpy as jnp
from jax import lax
from jax.experimental import pallas as pl
from jax.experimental.pallas import tpu as pltpu

N_BINS = 15
N_EDGES = N_BINS + 1           # 16 cumulative ">= edge" accumulators
LANES = 128
SUBLANES = 8
MAX_TILE_ROWS = 512            # (512, 128) f32 = 256 KiB per input block
NCORES = 2                     # leading "parallel" grid axis (both TCs on v7x)

# Bin edges exactly as the reference builds them (np.linspace); last bin end -> 1.01.
# Comparisons happen in float32 (torch compares an f32 tensor against python-float edges
# in f32), so bake the f32-rounded edge values.
_EDGES = [float(np.float32(v)) for v in np.linspace(0.0, 1.0, N_BINS + 1)[:-1]] + [1.01]


def _make_kernel(tile_rows, valid_rows, blocks_per_core):
    sub = tile_rows // SUBLANES

    def kernel(p_ref, y_ref, out_ref):
        c = pl.program_id(0)           # "core" (parallel) axis
        i = pl.program_id(1)           # reduction axis over row blocks

        @pl.when(i == 0)
        def _init():
            out_ref[...] = jnp.zeros_like(out_ref)

        # Logical row-block index (may run past the real data for the clamped /
        # duplicated trailing blocks of the 2-way core split -> fully masked below).
        blk = c * blocks_per_core + i
        rows_left = valid_rows - blk * tile_rows
        row_ids = lax.broadcasted_iota(jnp.int32, (tile_rows, LANES), 0)
        ok = row_ids < rows_left
        p = jnp.where(ok, p_ref[...], -1.0)     # -1 falls in no bin
        y = jnp.where(ok, y_ref[...], 0.0)

        p3 = p.reshape(sub, SUBLANES, LANES)    # leading-axis sums = pure VPU adds
        y3 = y.reshape(sub, SUBLANES, LANES)

        # total y (for frac_pos)
        out_ref[3, 0] += jnp.sum(y3, axis=0)

        # cumulative ">= edge_e" per-lane partial sums (compare/select/add only)
        for e in range(N_EDGES):
            g = p3 >= _EDGES[e]
            out_ref[0, e] += jnp.sum(jnp.where(g, p3, 0.0), axis=0)
            out_ref[1, e] += jnp.sum(jnp.where(g, y3, 0.0), axis=0)
            out_ref[2, e] += jnp.sum(g.astype(jnp.float32), axis=0)

    return kernel


def ice_soft_pallas(pred_probas, y_true, n_bins=N_BINS):
    assert n_bins == N_BINS
    n = int(pred_probas.shape[0])
    if n == 0:
        return jnp.float32(np.nan)      # matches "return np.nan" for empty input

    p = jnp.asarray(pred_probas, jnp.float32).reshape(-1)
    y = jnp.asarray(y_true, jnp.float32).reshape(-1)

    # Pad only up to one (8,128) vreg worth of elements (no full-tile padding copy).
    chunk = SUBLANES * LANES            # 1024
    pad = (-n) % chunk
    if pad:
        p = jnp.concatenate([p, jnp.full((pad,), -1.0, jnp.float32)])
        y = jnp.concatenate([y, jnp.zeros((pad,), jnp.float32)])
    rows = (n + pad) // LANES           # multiple of 8, >= 8
    p2 = p.reshape(rows, LANES)
    y2 = y.reshape(rows, LANES)

    tile_rows = min(MAX_TILE_ROWS, rows)          # multiple of 8, never exceeds array
    n_blocks = -(-rows // tile_rows)              # total row blocks
    blocks_per_core = -(-n_blocks // NCORES)

    def in_map(c, i):
        # Clamp so duplicated trailing blocks of the core split stay in bounds;
        # the kernel's row-validity mask discards their contribution.
        return (jnp.minimum(c * blocks_per_core + i, n_blocks - 1), 0)

    kernel = _make_kernel(tile_rows, rows, blocks_per_core)

    stats = pl.pallas_call(
        kernel,
        out_shape=jax.ShapeDtypeStruct(
            (NCORES, 4, N_EDGES, SUBLANES, LANES), jnp.float32),
        grid_spec=pltpu.PrefetchScalarGridSpec(
            num_scalar_prefetch=0,
            grid=(NCORES, blocks_per_core),
            in_specs=[pl.BlockSpec((tile_rows, LANES), in_map),
                      pl.BlockSpec((tile_rows, LANES), in_map)],
            out_specs=pl.BlockSpec((None, 4, N_EDGES, SUBLANES, LANES),
                                   lambda c, i: (c, 0, 0, 0, 0)),
        ),
        compiler_params=pltpu.CompilerParams(
            dimension_semantics=("parallel", "arbitrary")),
    )(p2, y2)

    # --- tiny epilogue in plain JAX (cross-lane reduce + scalar math) ---
    red = jnp.sum(stats, axis=(0, 3, 4))          # (4, N_EDGES)
    sp, sy, cn = red[0], red[1], red[2]
    tot_y = red[3, 0]

    sum_p = sp[:N_BINS] - sp[1:]                  # per-bin sums via edge differences
    sum_y = sy[:N_BINS] - sy[1:]
    cnt = cn[:N_BINS] - cn[1:]

    frac_pos = tot_y / n
    w = cnt ** (0.5 + frac_pos)                   # len(bin) ** (0.5 + frac_pos)
    ece_bin = jnp.abs(sum_p - sum_y) / cnt * w    # NaN where cnt == 0 (empty bin)
    numer = jnp.sum(jnp.where(cnt > 0, ece_bin, 0.0))   # pd.Series(...).dropna()
    denom = jnp.sum(w)                            # 0 ** positive == 0 for empty bins
    return numer / denom


def ice_soft_ref(pred_probas, y_true, n_bins=N_BINS):
    """Pure-numpy replica of the PyTorch reference, for verification."""
    pred = np.asarray(pred_probas, dtype=np.float64)
    y = np.asarray(y_true, dtype=np.float64)
    if pred.shape[0] == 0:
        return np.nan
    bins = np.linspace(0, 1, n_bins + 1)
    frac_pos = y.sum() / y.shape[0]
    num, sw = 0.0, 0.0
    for b in range(n_bins):
        lo, hi = bins[b], bins[b + 1]
        if hi == 1:
            hi = 1.01
        m = (pred >= lo) & (pred < hi)
        cnt = int(m.sum())
        w = cnt ** (0.5 + frac_pos)
        sw += w
        if cnt > 0:
            num += abs(pred[m].mean() - y[m].mean()) * w
    return num / sw


if __name__ == "__main__":
    key = jax.random.PRNGKey(0)

    def run_case(n, k):
        k1, k2 = jax.random.split(k)
        # top-confidences in [0.5, 1] and correctness labels (roughly calibrated)
        pred = jax.random.uniform(k1, (n,), jnp.float32, minval=0.5, maxval=1.0)
        y = (jax.random.uniform(k2, (n,), jnp.float32) < pred).astype(jnp.float32)
        out = jax.block_until_ready(ice_soft_pallas(pred, y))
        ref = ice_soft_ref(np.asarray(pred), np.asarray(y))
        assert np.isfinite(float(out)), ("non-finite result", n, float(out))
        assert abs(float(out) - ref) <= 1e-3 * max(1.0, abs(ref)), (n, float(out), ref)

    ka, kb = jax.random.split(key)
    run_case(1500, ka)      # single grid step, padding + heavy block masking path
    run_case(200_000, kb)   # multi-step reduction, partial trailing block, both "cores"
    print("KERNEL_OK")
</pallas_src>

<mosaic_0001>
module attributes {stable_mosaic.version = 11 : i64} {
  func.func @kernel(%arg0: i32, %arg1: i32, %arg2: memref<16x128xf32, #tpu.memory_space<vmem>>, %arg3: memref<16x128xf32, #tpu.memory_space<vmem>>, %arg4: memref<1x4x16x8x128xf32, #tpu.memory_space<vmem>>) attributes {dimension_semantics = [#tpu.dimension_semantics<parallel>, #tpu.dimension_semantics<arbitrary>], iteration_bounds = array<i64: 2, 1>, scalar_prefetch = 0 : i64, scratch_operands = 0 : i64, tpu.core_type = #tpu.core_type<tc>, window_params = [{transform_indices = @transform_0, window_bounds = array<i64: 16, 128>}, {transform_indices = @transform_1, window_bounds = array<i64: 16, 128>}, {transform_indices = @transform_2, window_bounds = array<i64: 1, 4, 16, 8, 128>}]} {
    %c0_i32 = arith.constant 0 : i32
    %0 = arith.cmpi eq, %arg1, %c0_i32 : i32
    %1 = arith.extui %0 : i1 to i32
    %c0_i32_0 = arith.constant 0 : i32
    %2 = arith.cmpi ne, %1, %c0_i32_0 : i32
    scf.if %2 {
      %cst_578 = arith.constant 0.000000e+00 : f32
      %489 = vector.broadcast %cst_578 : f32 to vector<4x16x8x128xf32>
      %c0_579 = arith.constant 0 : index
      %c0_580 = arith.constant 0 : index
      %c0_581 = arith.constant 0 : index
      %c0_582 = arith.constant 0 : index
      %c0_583 = arith.constant 0 : index
      %490 = vector.load %arg4[%c0_579, %c0_580, %c0_581, %c0_582, %c0_583] : memref<1x4x16x8x128xf32, #tpu.memory_space<vmem>>, vector<1x4x16x8x128xf32>
      %491 = vector.shape_cast %490 : vector<1x4x16x8x128xf32> to vector<4x16x8x128xf32>
      %492 = vector.shape_cast %489 : vector<4x16x8x128xf32> to vector<1x4x16x8x128xf32>
      tpu.vector_store %arg4[%c0_579, %c0_580, %c0_581, %c0_582, %c0_583], %492 {strides = array<i32>} : memref<1x4x16x8x128xf32, #tpu.memory_space<vmem>>, vector<1x4x16x8x128xf32>,
    } else {
    }
    %c1_i32 = arith.constant 1 : i32
    %3 = arith.muli %arg0, %c1_i32 : i32
    %4 = arith.addi %3, %arg1 : i32
    %c16_i32 = arith.constant 16 : i32
    %5 = arith.muli %4, %c16_i32 : i32
    %c16_i32_1 = arith.constant 16 : i32
    %6 = arith.subi %c16_i32_1, %5 : i32
    %7 = tpu.iota {dimensions = array<i32: 0>} : vector<16x128xi32>
    %8 = vector.broadcast %6 : i32 to vector<16x128xi32>
    %9 = arith.cmpi slt, %7, %8 : vector<16x128xi32>
    %c0 = arith.constant 0 : index
    %c0_2 = arith.constant 0 : index
    %10 = vector.load %arg2[%c0, %c0_2] : memref<16x128xf32, #tpu.memory_space<vmem>>, vector<16x128xf32>
    %cst = arith.constant -1.000000e+00 : f32
    %11 = vector.broadcast %cst : f32 to vector<16x128xf32>
    %12 = arith.select %9, %10, %11 : vector<16x128xi1>, vector<16x128xf32>
    %c0_3 = arith.constant 0 : index
    %c0_4 = arith.constant 0 : index
    %13 = vector.load %arg3[%c0_3, %c0_4] : memref<16x128xf32, #tpu.memory_space<vmem>>, vector<16x128xf32>
    %cst_5 = arith.constant 0.000000e+00 : f32
    %14 = vector.broadcast %cst_5 : f32 to vector<16x128xf32>
    %15 = arith.select %9, %13, %14 : vector<16x128xi1>, vector<16x128xf32>
    %16 = vector.shape_cast %12 : vector<16x128xf32> to vector<2x8x128xf32>
    %17 = vector.shape_cast %15 : vector<16x128xf32> to vector<2x8x128xf32>
    %c0_6 = arith.constant 0 : index
    %c3 = arith.constant 3 : index
    %c0_7 = arith.constant 0 : index
    %c0_8 = arith.constant 0 : index
    %c0_9 = arith.constant 0 : index
    %18 = vector.load %arg4[%c0_6, %c3, %c0_7, %c0_8, %c0_9] : memref<1x4x16x8x128xf32, #tpu.memory_space<vmem>>, vector<1x1x1x8x128xf32>
    %19 = vector.shape_cast %18 : vector<1x1x1x8x128xf32> to vector<8x128xf32>
    %cst_10 = arith.constant dense<0.000000e+00> : vector<8x128xf32>
    %20 = vector.multi_reduction <add>, %17, %cst_10 [0] : vector<2x8x128xf32> to vector<8x128xf32>
    %21 = arith.addf %19, %20 : vector<8x128xf32>
    %c0_11 = arith.constant 0 : index
    %c3_12 = arith.constant 3 : index
    %c0_13 = arith.constant 0 : index
    %c0_14 = arith.constant 0 : index
    %c0_15 = arith.constant 0 : index
    %22 = vector.load %arg4[%c0_11, %c3_12, %c0_13, %c0_14, %c0_15] : memref<1x4x16x8x128xf32, #tpu.memory_space<vmem>>, vector<1x1x1x8x128xf32>
    %23 = vector.shape_cast %22 : vector<1x1x1x8x128xf32> to vector<8x128xf32>
    %24 = vector.shape_cast %21 : vector<8x128xf32> to vector<1x1x1x8x128xf32>
    tpu.vector_store %arg4[%c0_11, %c3_12, %c0_13, %c0_14, %c0_15], %24 {strides = array<i32>} : memref<1x4x16x8x128xf32, #tpu.memory_space<vmem>>, vector<1x1x1x8x128xf32>,
    %cst_16 = arith.constant 0.000000e+00 : f32
    %25 = vector.broadcast %cst_16 : f32 to vector<2x8x128xf32>
    %26 = arith.cmpf oge, %16, %25 : vector<2x8x128xf32>
    %c0_17 = arith.constant 0 : index
    %c0_18 = arith.constant 0 : index
    %c0_19 = arith.constant 0 : index
    %c0_20 = arith.constant 0 : index
    %c0_21 = arith.constant 0 : index
    %27 = vector.load %arg4[%c0_17, %c0_18, %c0_19, %c0_20, %c0_21] : memref<1x4x16x8x128xf32, #tpu.memory_space<vmem>>, vector<1x1x1x8x128xf32>
    %28 = vector.shape_cast %27 : vector<1x1x1x8x128xf32> to vector<8x128xf32>
    %cst_22 = arith.constant 0.000000e+00 : f32
    %29 = vector.broadcast %cst_22 : f32 to vector<2x8x128xf32>
    %30 = arith.select %26, %16, %29 : vector<2x8x128xi1>, vector<2x8x128xf32>
    %cst_23 = arith.constant dense<0.000000e+00> : vector<8x128xf32>
    %31 = vector.multi_reduction <add>, %30, %cst_23 [0] : vector<2x8x128xf32> to vector<8x128xf32>
    %32 = arith.addf %28, %31 : vector<8x128xf32>
    %c0_24 = arith.constant 0 : index
    %c0_25 = arith.constant 0 : index
    %c0_26 = arith.constant 0 : index
    %c0_27 = arith.constant 0 : index
    %c0_28 = arith.constant 0 : index
    %33 = vector.load %arg4[%c0_24, %c0_25, %c0_26, %c0_27, %c0_28] : memref<1x4x16x8x128xf32, #tpu.memory_space<vmem>>, vector<1x1x1x8x128xf32>
    %34 = vector.shape_cast %33 : vector<1x1x1x8x128xf32> to vector<8x128xf32>
    %35 = vector.shape_cast %32 : vector<8x128xf32> to vector<1x1x1x8x128xf32>
    tpu.vector_store %arg4[%c0_24, %c0_25, %c0_26, %c0_27, %c0_28], %35 {strides = array<i32>} : memref<1x4x16x8x128xf32, #tpu.memory_space<vmem>>, vector<1x1x1x8x128xf32>,
    %c0_29 = arith.constant 0 : index
    %c1 = arith.constant 1 : index
    %c0_30 = arith.constant 0 : index
    %c0_31 = arith.constant 0 : index
    %c0_32 = arith.constant 0 : index
    %36 = vector.load %arg4[%c0_29, %c1, %c0_30, %c0_31, %c0_32] : memref<1x4x16x8x128xf32, #tpu.memory_space<vmem>>, vector<1x1x1x8x128xf32>
    %37 = vector.shape_cast %36 : vector<1x1x1x8x128xf32> to vector<8x128xf32>
    %cst_33 = arith.constant 0.000000e+00 : f32
    %38 = vector.broadcast %cst_33 : f32 to vector<2x8x128xf32>
    %39 = arith.select %26, %17, %38 : vector<2x8x128xi1>, vector<2x8x128xf32>
    %cst_34 = arith.constant dense<0.000000e+00> : vector<8x128xf32>
    %40 = vector.multi_reduction <add>, %39, %cst_34 [0] : vector<2x8x128xf32> to vector<8x128xf32>
    %41 = arith.addf %37, %40 : vector<8x128xf32>
    %c0_35 = arith.constant 0 : index
    %c1_36 = arith.constant 1 : index
    %c0_37 = arith.constant 0 : index
    %c0_38 = arith.constant 0 : index
    %c0_39 = arith.constant 0 : index
    %42 = vector.load %arg4[%c0_35, %c1_36, %c0_37, %c0_38, %c0_39] : memref<1x4x16x8x128xf32, #tpu.memory_space<vmem>>, vector<1x1x1x8x128xf32>
    %43 = vector.shape_cast %42 : vector<1x1x1x8x128xf32> to vector<8x128xf32>
    %44 = vector.shape_cast %41 : vector<8x128xf32> to vector<1x1x1x8x128xf32>
    tpu.vector_store %arg4[%c0_35, %c1_36, %c0_37, %c0_38, %c0_39], %44 {strides = array<i32>} : memref<1x4x16x8x128xf32, #tpu.memory_space<vmem>>, vector<1x1x1x8x128xf32>,
    %c0_40 = arith.constant 0 : index
    %c2 = arith.constant 2 : index
    %c0_41 = arith.constant 0 : index
    %c0_42 = arith.constant 0 : index
    %c0_43 = arith.constant 0 : index
    %45 = vector.load %arg4[%c0_40, %c2, %c0_41, %c0_42, %c0_43] : memref<1x4x16x8x128xf32, #tpu.memory_space<vmem>>, vector<1x1x1x8x128xf32>
    %46 = vector.shape_cast %45 : vector<1x1x1x8x128xf32> to vector<8x128xf32>
    %47 = arith.extui %26 : vector<2x8x128xi1> to vector<2x8x128xi32>
    %48 = arith.sitofp %47 : vector<2x8x128xi32> to vector<2x8x128xf32>
    %cst_44 = arith.constant dense<0.000000e+00> : vector<8x128xf32>
    %49 = vector.multi_reduction <add>, %48, %cst_44 [0] : vector<2x8x128xf32> to vector<8x128xf32>
    %50 = arith.addf %46, %49 : vector<8x128xf32>
    %c0_45 = arith.constant 0 : index
    %c2_46 = arith.constant 2 : index
    %c0_47 = arith.constant 0 : index
    %c0_48 = arith.constant 0 : index
    %c0_49 = arith.constant 0 : index
    %51 = vector.load %arg4[%c0_45, %c2_46, %c0_47, %c0_48, %c0_49] : memref<1x4x16x8x128xf32, #tpu.memory_space<vmem>>, vector<1x1x1x8x128xf32>
    %52 = vector.shape_cast %51 : vector<1x1x1x8x128xf32> to vector<8x128xf32>
    %53 = vector.shape_cast %50 : vector<8x128xf32> to vector<1x1x1x8x128xf32>
    tpu.vector_store %arg4[%c0_45, %c2_46, %c0_47, %c0_48, %c0_49], %53 {strides = array<i32>} : memref<1x4x16x8x128xf32, #tpu.memory_space<vmem>>, vector<1x1x1x8x128xf32>,
    %cst_50 = arith.constant 0.0666666701 : f32
    %54 = vector.broadcast %cst_50 : f32 to vector<2x8x128xf32>
    %55 = arith.cmpf oge, %16, %54 : vector<2x8x128xf32>
    %c0_51 = arith.constant 0 : index
    %c0_52 = arith.constant 0 : index
    %c1_53 = arith.constant 1 : index
    %c0_54 = arith.constant 0 : index
    %c0_55 = arith.constant 0 : index
    %56 = vector.load %arg4[%c0_51, %c0_52, %c1_53, %c0_54, %c0_55] : memref<1x4x16x8x128xf32, #tpu.memory_space<vmem>>, vector<1x1x1x8x128xf32>
    %57 = vector.shape_cast %56 : vector<1x1x1x8x128xf32> to vector<8x128xf32>
    %cst_56 = arith.constant 0.000000e+00 : f32
    %58 = vector.broadcast %cst_56 : f32 to vector<2x8x128xf32>
    %59 = arith.select %55, %16, %58 : vector<2x8x128xi1>, vector<2x8x128xf32>
    %cst_57 = arith.constant dense<0.000000e+00> : vector<8x128xf32>
    %60 = vector.multi_reduction <add>, %59, %cst_57 [0] : vector<2x8x128xf32> to vector<8x128xf32>
    %61 = arith.addf %57, %60 : vector<8x128xf32>
    %c0_58 = arith.constant 0 : index
    %c0_59 = arith.constant 0 : index
    %c1_60 = arith.constant 1 : index
    %c0_61 = arith.constant 0 : index
    %c0_62 = arith.constant 0 : index
    %62 = vector.load %arg4[%c0_58, %c0_59, %c1_60, %c0_61, %c0_62] : memref<1x4x16x8x128xf32, #tpu.memory_space<vmem>>, vector<1x1x1x8x128xf32>
    %63 = vector.shape_cast %62 : vector<1x1x1x8x128xf32> to vector<8x128xf32>
    %64 = vector.shape_cast %61 : vector<8x128xf32> to vector<1x1x1x8x128xf32>
    tpu.vector_store %arg4[%c0_58, %c0_59, %c1_60, %c0_61, %c0_62], %64 {strides = array<i32>} : memref<1x4x16x8x128xf32, #tpu.memory_space<vmem>>, vector<1x1x1x8x128xf32>,
    %c0_63 = arith.constant 0 : index
    %c1_64 = arith.constant 1 : index
    %c1_65 = arith.constant 1 : index
    %c0_66 = arith.constant 0 : index
    %c0_67 = arith.constant 0 : index
    %65 = vector.load %arg4[%c0_63, %c1_64, %c1_65, %c0_66, %c0_67] : memref<1x4x16x8x128xf32, #tpu.memory_space<vmem>>, vector<1x1x1x8x128xf32>
    %66 = vector.shape_cast %65 : vector<1x1x1x8x128xf32> to vector<8x128xf32>
    %cst_68 = arith.constant 0.000000e+00 : f32
    %67 = vector.broadcast %cst_68 : f32 to vector<2x8x128xf32>
    %68 = arith.select %55, %17, %67 : vector<2x8x128xi1>, vector<2x8x128xf32>
    %cst_69 = arith.constant dense<0.000000e+00> : vector<8x128xf32>
    %69 = vector.multi_reduction <add>, %68, %cst_69 [0] : vector<2x8x128xf32> to vector<8x128xf32>
    %70 = arith.addf %66, %69 : vector<8x128xf32>
    %c0_70 = arith.constant 0 : index
    %c1_71 = arith.constant 1 : index
    %c1_72 = arith.constant 1 : index
    %c0_73 = arith.constant 0 : index
    %c0_74 = arith.constant 0 : index
    %71 = vector.load %arg4[%c0_70, %c1_71, %c1_72, %c0_73, %c0_74] : memref<1x4x16x8x128xf32, #tpu.memory_space<vmem>>, vector<1x1x1x8x128xf32>
    %72 = vector.shape_cast %71 : vector<1x1x1x8x128xf32> to vector<8x128xf32>
    %73 = vector.shape_cast %70 : vector<8x128xf32> to vector<1x1x1x8x128xf32>
    tpu.vector_store %arg4[%c0_70, %c1_71, %c1_72, %c0_73, %c0_74], %73 {strides = array<i32>} : memref<1x4x16x8x128xf32, #tpu.memory_space<vmem>>, vector<1x1x1x8x128xf32>,
    %c0_75 = arith.constant 0 : index
    %c2_76 = arith.constant 2 : index
    %c1_77 = arith.constant 1 : index
    %c0_78 = arith.constant 0 : index
    %c0_79 = arith.constant 0 : index
    %74 = vector.load %arg4[%c0_75, %c2_76, %c1_77, %c0_78, %c0_79] : memref<1x4x16x8x128xf32, #tpu.memory_space<vmem>>, vector<1x1x1x8x128xf32>
    %75 = vector.shape_cast %74 : vector<1x1x1x8x128xf32> to vector<8x128xf32>
    %76 = arith.extui %55 : vector<2x8x128xi1> to vector<2x8x128xi32>
    %77 = arith.sitofp %76 : vector<2x8x128xi32> to vector<2x8x128xf32>
    %cst_80 = arith.constant dense<0.000000e+00> : vector<8x128xf32>
    %78 = vector.multi_reduction <add>, %77, %cst_80 [0] : vector<2x8x128xf32> to vector<8x128xf32>
    %79 = arith.addf %75, %78 : vector<8x128xf32>
    %c0_81 = arith.constant 0 : index
    %c2_82 = arith.constant 2 : index
    %c1_83 = arith.constant 1 : index
    %c0_84 = arith.constant 0 : index
    %c0_85 = arith.constant 0 : index
    %80 = vector.load %arg4[%c0_81, %c2_82, %c1_83, %c0_84, %c0_85] : memref<1x4x16x8x128xf32, #tpu.memory_space<vmem>>, vector<1x1x1x8x128xf32>
    %81 = vector.shape_cast %80 : vector<1x1x1x8x128xf32> to vector<8x128xf32>
    %82 = vector.shape_cast %79 : vector<8x128xf32> to vector<1x1x1x8x128xf32>
    tpu.vector_store %arg4[%c0_81, %c2_82, %c1_83, %c0_84, %c0_85], %82 {strides = array<i32>} : memref<1x4x16x8x128xf32, #tpu.memory_space<vmem>>, vector<1x1x1x8x128xf32>,
    %cst_86 = arith.constant 0.13333334 : f32
    %83 = vector.broadcast %cst_86 : f32 to vector<2x8x128xf32>
    %84 = arith.cmpf oge, %16, %83 : vector<2x8x128xf32>
    %c0_87 = arith.constant 0 : index
    %c0_88 = arith.constant 0 : index
    %c2_89 = arith.constant 2 : index
    %c0_90 = arith.constant 0 : index
    %c0_91 = arith.constant 0 : index
    %85 = vector.load %arg4[%c0_87, %c0_88, %c2_89, %c0_90, %c0_91] : memref<1x4x16x8x128xf32, #tpu.memory_space<vmem>>, vector<1x1x1x8x128xf32>
    %86 = vector.shape_cast %85 : vector<1x1x1x8x128xf32> to vector<8x128xf32>
    %cst_92 = arith.constant 0.000000e+00 : f32
    %87 = vector.broadcast %cst_92 : f32 to vector<2x8x128xf32>
    %88 = arith.select %84, %16, %87 : vector<2x8x128xi1>, vector<2x8x128xf32>
    %cst_93 = arith.constant dense<0.000000e+00> : vector<8x128xf32>
    %89 = vector.multi_reduction <add>, %88, %cst_93 [0] : vector<2x8x128xf32> to vector<8x128xf32>
    %90 = arith.addf %86, %89 : vector<8x128xf32>
    %c0_94 = arith.constant 0 : index
    %c0_95 = arith.constant 0 : index
    %c2_96 = arith.constant 2 : index
    %c0_97 = arith.constant 0 : index
    %c0_98 = arith.constant 0 : index
    %91 = vector.load %arg4[%c0_94, %c0_95, %c2_96, %c0_97, %c0_98] : memref<1x4x16x8x128xf32, #tpu.memory_space<vmem>>, vector<1x1x1x8x128xf32>
    %92 = vector.shape_cast %91 : vector<1x1x1x8x128xf32> to vector<8x128xf32>
    %93 = vector.shape_cast %90 : vector<8x128xf32> to vector<1x1x1x8x128xf32>
    tpu.vector_store %arg4[%c0_94, %c0_95, %c2_96, %c0_97, %c0_98], %93 {strides = array<i32>} : memref<1x4x16x8x128xf32, #tpu.memory_space<vmem>>, vector<1x1x1x8x128xf32>,
    %c0_99 = arith.constant 0 : index
    %c1_100 = arith.constant 1 : index
    %c2_101 = arith.constant 2 : index
    %c0_102 = arith.constant 0 : index
    %c0_103 = arith.constant 0 : index
    %94 = vector.load %arg4[%c0_99, %c1_100, %c2_101, %c0_102, %c0_103] : memref<1x4x16x8x128xf32, #tpu.memory_space<vmem>>, vector<1x1x1x8x128xf32>
    %95 = vector.shape_cast %94 : vector<1x1x1x8x128xf32> to vector<8x128xf32>
    %cst_104 = arith.constant 0.000000e+00 : f32
    %96 = vector.broadcast %cst_104 : f32 to vector<2x8x128xf32>
    %97 = arith.select %84, %17, %96 : vector<2x8x128xi1>, vector<2x8x128xf32>
    %cst_105 = arith.constant dense<0.000000e+00> : vector<8x128xf32>
    %98 = vector.multi_reduction <add>, %97, %cst_105 [0] : vector<2x8x128xf32> to vector<8x128xf32>
    %99 = arith.addf %95, %98 : vector<8x128xf32>
    %c0_106 = arith.constant 0 : index
    %c1_107 = arith.constant 1 : index
    %c2_108 = arith.constant 2 : index
    %c0_109 = arith.constant 0 : index
    %c0_110 = arith.constant 0 : index
    %100 = vector.load %arg4[%c0_106, %c1_107, %c2_108, %c0_109, %c0_110] : memref<1x4x16x8x128xf32, #tpu.memory_space<vmem>>, vector<1x1x1x8x128xf32>
    %101 = vector.shape_cast %100 : vector<1x1x1x8x128xf32> to vector<8x128xf32>
    %102 = vector.shape_cast %99 : vector<8x128xf32> to vector<1x1x1x8x128xf32>
    tpu.vector_store %arg4[%c0_106, %c1_107, %c2_108, %c0_109, %c0_110], %102 {strides = array<i32>} : memref<1x4x16x8x128xf32, #tpu.memory_space<vmem>>, vector<1x1x1x8x128xf32>,
    %c0_111 = arith.constant 0 : index
    %c2_112 = arith.constant 2 : index
    %c2_113 = arith.constant 2 : index
    %c0_114 = arith.constant 0 : index
    %c0_115 = arith.constant 0 : index
    %103 = vector.load %arg4[%c0_111, %c2_112, %c2_113, %c0_114, %c0_115] : memref<1x4x16x8x128xf32, #tpu.memory_space<vmem>>, vector<1x1x1x8x128xf32>
    %104 = vector.shape_cast %103 : vector<1x1x1x8x128xf32> to vector<8x128xf32>
    %105 = arith.extui %84 : vector<2x8x128xi1> to vector<2x8x128xi32>
    %106 = arith.sitofp %105 : vector<2x8x128xi32> to vector<2x8x128xf32>
    %cst_116 = arith.constant dense<0.000000e+00> : vector<8x128xf32>
    %107 = vector.multi_reduction <add>, %106, %cst_116 [0] : vector<2x8x128xf32> to vector<8x128xf32>
    %108 = arith.addf %104, %107 : vector<8x128xf32>
    %c0_117 = arith.constant 0 : index
    %c2_118 = arith.constant 2 : index
    %c2_119 = arith.constant 2 : index
    %c0_120 = arith.constant 0 : index
    %c0_121 = arith.constant 0 : index
    %109 = vector.load %arg4[%c0_117, %c2_118, %c2_119, %c0_120, %c0_121] : memref<1x4x16x8x128xf32, #tpu.memory_space<vmem>>, vector<1x1x1x8x128xf32>
    %110 = vector.shape_cast %109 : vector<1x1x1x8x128xf32> to vector<8x128xf32>
    %111 = vector.shape_cast %108 : vector<8x128xf32> to vector<1x1x1x8x128xf32>
    tpu.vector_store %arg4[%c0_117, %c2_118, %c2_119, %c0_120, %c0_121], %111 {strides = array<i32>} : memref<1x4x16x8x128xf32, #tpu.memory_space<vmem>>, vector<1x1x1x8x128xf32>,
    %cst_122 = arith.constant 2.000000e-01 : f32
    %112 = vector.broadcast %cst_122 : f32 to vector<2x8x128xf32>
    %113 = arith.cmpf oge, %16, %112 : vector<2x8x128xf32>
    %c0_123 = arith.constant 0 : index
    %c0_124 = arith.constant 0 : index
    %c3_125 = arith.constant 3 : index
    %c0_126 = arith.constant 0 : index
    %c0_127 = arith.constant 0 : index
    %114 = vector.load %arg4[%c0_123, %c0_124, %c3_125, %c0_126, %c0_127] : memref<1x4x16x8x128xf32, #tpu.memory_space<vmem>>, vector<1x1x1x8x128xf32>
    %115 = vector.shape_cast %114 : vector<1x1x1x8x128xf32> to vector<8x128xf32>
    %cst_128 = arith.constant 0.000000e+00 : f32
    %116 = vector.broadcast %cst_128 : f32 to vector<2x8x128xf32>
    %117 = arith.select %113, %16, %116 : vector<2x8x128xi1>, vector<2x8x128xf32>
    %cst_129 = arith.constant dense<0.000000e+00> : vector<8x128xf32>
    %118 = vector.multi_reduction <add>, %117, %cst_129 [0] : vector<2x8x128xf32> to vector<8x128xf32>
    %119 = arith.addf %115, %118 : vector<8x128xf32>
    %c0_130 = arith.constant 0 : index
    %c0_131 = arith.constant 0 : index
    %c3_132 = arith.constant 3 : index
    %c0_133 = arith.constant 0 : index
    %c0_134 = arith.constant 0 : index
    %120 = vector.load %arg4[%c0_130, %c0_131, %c3_132, %c0_133, %c0_134] : memref<1x4x16x8x128xf32, #tpu.memory_space<vmem>>, vector<1x1x1x8x128xf32>
    %121 = vector.shape_cast %120 : vector<1x1x1x8x128xf32> to vector<8x128xf32>
    %122 = vector.shape_cast %119 : vector<8x128xf32> to vector<1x1x1x8x128xf32>
    tpu.vector_store %arg4[%c0_130, %c0_131, %c3_132, %c0_133, %c0_134], %122 {strides = array<i32>} : memref<1x4x16x8x128xf32, #tpu.memory_space<vmem>>, vector<1x1x1x8x128xf32>,
    %c0_135 = arith.constant 0 : index
    %c1_136 = arith.constant 1 : index
    %c3_137 = arith.constant 3 : index
    %c0_138 = arith.constant 0 : index
    %c0_139 = arith.constant 0 : index
    %123 = vector.load %arg4[%c0_135, %c1_136, %c3_137, %c0_138, %c0_139] : memref<1x4x16x8x128xf32, #tpu.memory_space<vmem>>, vector<1x1x1x8x128xf32>
    %124 = vector.shape_cast %123 : vector<1x1x1x8x128xf32> to vector<8x128xf32>
    %cst_140 = arith.constant 0.000000e+00 : f32
    %125 = vector.broadcast %cst_140 : f32 to vector<2x8x128xf32>
    %126 = arith.select %113, %17, %125 : vector<2x8x128xi1>, vector<2x8x128xf32>
    %cst_141 = arith.constant dense<0.000000e+00> : vector<8x128xf32>
    %127 = vector.multi_reduction <add>, %126, %cst_141 [0] : vector<2x8x128xf32> to vector<8x128xf32>
    %128 = arith.addf %124, %127 : vector<8x128xf32>
    %c0_142 = arith.constant 0 : index
    %c1_143 = arith.constant 1 : index
    %c3_144 = arith.constant 3 : index
    %c0_145 = arith.constant 0 : index
    %c0_146 = arith.constant 0 : index
    %129 = vector.load %arg4[%c0_142, %c1_143, %c3_144, %c0_145, %c0_146] : memref<1x4x16x8x128xf32, #tpu.memory_space<vmem>>, vector<1x1x1x8x128xf32>
    %130 = vector.shape_cast %129 : vector<1x1x1x8x128xf32> to vector<8x128xf32>
    %131 = vector.shape_cast %128 : vector<8x128xf32> to vector<1x1x1x8x128xf32>
    tpu.vector_store %arg4[%c0_142, %c1_143, %c3_144, %c0_145, %c0_146], %131 {strides = array<i32>} : memref<1x4x16x8x128xf32, #tpu.memory_space<vmem>>, vector<1x1x1x8x128xf32>,
    %c0_147 = arith.constant 0 : index
    %c2_148 = arith.constant 2 : index
    %c3_149 = arith.constant 3 : index
    %c0_150 = arith.constant 0 : index
    %c0_151 = arith.constant 0 : index
    %132 = vector.load %arg4[%c0_147, %c2_148, %c3_149, %c0_150, %c0_151] : memref<1x4x16x8x128xf32, #tpu.memory_space<vmem>>, vector<1x1x1x8x128xf32>
    %133 = vector.shape_cast %132 : vector<1x1x1x8x128xf32> to vector<8x128xf32>
    %134 = arith.extui %113 : vector<2x8x128xi1> to vector<2x8x128xi32>
    %135 = arith.sitofp %134 : vector<2x8x128xi32> to vector<2x8x128xf32>
    %cst_152 = arith.constant dense<0.000000e+00> : vector<8x128xf32>
    %136 = vector.multi_reduction <add>, %135, %cst_152 [0] : vector<2x8x128xf32> to vector<8x128xf32>
    %137 = arith.addf %133, %136 : vector<8x128xf32>
    %c0_153 = arith.constant 0 : index
    %c2_154 = arith.constant 2 : index
    %c3_155 = arith.constant 3 : index
    %c0_156 = arith.constant 0 : index
    %c0_157 = arith.constant 0 : index
    %138 = vector.load %arg4[%c0_153, %c2_154, %c3_155, %c0_156, %c0_157] : memref<1x4x16x8x128xf32, #tpu.memory_space<vmem>>, vector<1x1x1x8x128xf32>
    %139 = vector.shape_cast %138 : vector<1x1x1x8x128xf32> to vector<8x128xf32>
    %140 = vector.shape_cast %137 : vector<8x128xf32> to vector<1x1x1x8x128xf32>
    tpu.vector_store %arg4[%c0_153, %c2_154, %c3_155, %c0_156, %c0_157], %140 {strides = array<i32>} : memref<1x4x16x8x128xf32, #tpu.memory_space<vmem>>, vector<1x1x1x8x128xf32>,
    %cst_158 = arith.constant 0.266666681 : f32
    %141 = vector.broadcast %cst_158 : f32 to vector<2x8x128xf32>
    %142 = arith.cmpf oge, %16, %141 : vector<2x8x128xf32>
    %c0_159 = arith.constant 0 : index
    %c0_160 = arith.constant 0 : index
    %c4 = arith.constant 4 : index
    %c0_161 = arith.constant 0 : index
    %c0_162 = arith.constant 0 : index
    %143 = vector.load %arg4[%c0_159, %c0_160, %c4, %c0_161, %c0_162] : memref<1x4x16x8x128xf32, #tpu.memory_space<vmem>>, vector<1x1x1x8x128xf32>
    %144 = vector.shape_cast %143 : vector<1x1x1x8x128xf32> to vector<8x128xf32>
    %cst_163 = arith.constant 0.000000e+00 : f32
    %145 = vector.broadcast %cst_163 : f32 to vector<2x8x128xf32>
    %146 = arith.select %142, %16, %145 : vector<2x8x128xi1>, vector<2x8x128xf32>
    %cst_164 = arith.constant dense<0.000000e+00> : vector<8x128xf32>
    %147 = vector.multi_reduction <add>, %146, %cst_164 [0] : vector<2x8x128xf32> to vector<8x128xf32>
    %148 = arith.addf %144, %147 : vector<8x128xf32>
    %c0_165 = arith.constant 0 : index
    %c0_166 = arith.constant 0 : index
    %c4_167 = arith.constant 4 : index
    %c0_168 = arith.constant 0 : index
    %c0_169 = arith.constant 0 : index
    %149 = vector.load %arg4[%c0_165, %c0_166, %c4_167, %c0_168, %c0_169] : memref<1x4x16x8x128xf32, #tpu.memory_space<vmem>>, vector<1x1x1x8x128xf32>
    %150 = vector.shape_cast %149 : vector<1x1x1x8x128xf32> to vector<8x128xf32>
    %151 = vector.shape_cast %148 : vector<8x128xf32> to vector<1x1x1x8x128xf32>
    tpu.vector_store %arg4[%c0_165, %c0_166, %c4_167, %c0_168, %c0_169], %151 {strides = array<i32>} : memref<1x4x16x8x128xf32, #tpu.memory_space<vmem>>, vector<1x1x1x8x128xf32>,
    %c0_170 = arith.constant 0 : index
    %c1_171 = arith.constant 1 : index
    %c4_172 = arith.constant 4 : index
    %c0_173 = arith.constant 0 : index
    %c0_174 = arith.constant 0 : index
    %152 = vector.load %arg4[%c0_170, %c1_171, %c4_172, %c0_173, %c0_174] : memref<1x4x16x8x128xf32, #tpu.memory_space<vmem>>, vector<1x1x1x8x128xf32>
    %153 = vector.shape_cast %152 : vector<1x1x1x8x128xf32> to vector<8x128xf32>
    %cst_175 = arith.constant 0.000000e+00 : f32
    %154 = vector.broadcast %cst_175 : f32 to vector<2x8x128xf32>
    %155 = arith.select %142, %17, %154 : vector<2x8x128xi1>, vector<2x8x128xf32>
    %cst_176 = arith.constant dense<0.000000e+00> : vector<8x128xf32>
    %156 = vector.multi_reduction <add>, %155, %cst_176 [0] : vector<2x8x128xf32> to vector<8x128xf32>
    %157 = arith.addf %153, %156 : vector<8x128xf32>
    %c0_177 = arith.constant 0 : index
    %c1_178 = arith.constant 1 : index
    %c4_179 = arith.constant 4 : index
    %c0_180 = arith.constant 0 : index
    %c0_181 = arith.constant 0 : index
    %158 = vector.load %arg4[%c0_177, %c1_178, %c4_179, %c0_180, %c0_181] : memref<1x4x16x8x128xf32, #tpu.memory_space<vmem>>, vector<1x1x1x8x128xf32>
    %159 = vector.shape_cast %158 : vector<1x1x1x8x128xf32> to vector<8x128xf32>
    %160 = vector.shape_cast %157 : vector<8x128xf32> to vector<1x1x1x8x128xf32>
    tpu.vector_store %arg4[%c0_177, %c1_178, %c4_179, %c0_180, %c0_181], %160 {strides = array<i32>} : memref<1x4x16x8x128xf32, #tpu.memory_space<vmem>>, vector<1x1x1x8x128xf32>,
    %c0_182 = arith.constant 0 : index
    %c2_183 = arith.constant 2 : index
    %c4_184 = arith.constant 4 : index
    %c0_185 = arith.constant 0 : index
    %c0_186 = arith.constant 0 : index
    %161 = vector.load %arg4[%c0_182, %c2_183, %c4_184, %c0_185, %c0_186] : memref<1x4x16x8x128xf32, #tpu.memory_space<vmem>>, vector<1x1x1x8x128xf32>
    %162 = vector.shape_cast %161 : vector<1x1x1x8x128xf32> to vector<8x128xf32>
    %163 = arith.extui %142 : vector<2x8x128xi1> to vector<2x8x128xi32>
    %164 = arith.sitofp %163 : vector<2x8x128xi32> to vector<2x8x128xf32>
    %cst_187 = arith.constant dense<0.000000e+00> : vector<8x128xf32>
    %165 = vector.multi_reduction <add>, %164, %cst_187 [0] : vector<2x8x128xf32> to vector<8x128xf32>
    %166 = arith.addf %162, %165 : vector<8x128xf32>
    %c0_188 = arith.constant 0 : index
    %c2_189 = arith.constant 2 : index
    %c4_190 = arith.constant 4 : index
    %c0_191 = arith.constant 0 : index
    %c0_192 = arith.constant 0 : index
    %167 = vector.load %arg4[%c0_188, %c2_189, %c4_190, %c0_191, %c0_192] : memref<1x4x16x8x128xf32, #tpu.memory_space<vmem>>, vector<1x1x1x8x128xf32>
    %168 = vector.shape_cast %167 : vector<1x1x1x8x128xf32> to vector<8x128xf32>
    %169 = vector.shape_cast %166 : vector<8x128xf32> to vector<1x1x1x8x128xf32>
    tpu.vector_store %arg4[%c0_188, %c2_189, %c4_190, %c0_191, %c0_192], %169 {strides = array<i32>} : memref<1x4x16x8x128xf32, #tpu.memory_space<vmem>>, vector<1x1x1x8x128xf32>,
    %cst_193 = arith.constant 0.333333343 : f32
    %170 = vector.broadcast %cst_193 : f32 to vector<2x8x128xf32>
    %171 = arith.cmpf oge, %16, %170 : vector<2x8x128xf32>
    %c0_194 = arith.constant 0 : index
    %c0_195 = arith.constant 0 : index
    %c5 = arith.constant 5 : index
    %c0_196 = arith.constant 0 : index
    %c0_197 = arith.constant 0 : index
    %172 = vector.load %arg4[%c0_194, %c0_195, %c5, %c0_196, %c0_197] : memref<1x4x16x8x128xf32, #tpu.memory_space<vmem>>, vector<1x1x1x8x128xf32>
    %173 = vector.shape_cast %172 : vector<1x1x1x8x128xf32> to vector<8x128xf32>
    %cst_198 = arith.constant 0.000000e+00 : f32
    %174 = vector.broadcast %cst_198 : f32 to vector<2x8x128xf32>
    %175 = arith.select %171, %16, %174 : vector<2x8x128xi1>, vector<2x8x128xf32>
    %cst_199 = arith.constant dense<0.000000e+00> : vector<8x128xf32>
    %176 = vector.multi_reduction <add>, %175, %cst_199 [0] : vector<2x8x128xf32> to vector<8x128xf32>
    %177 = arith.addf %173, %176 : vector<8x128xf32>
    %c0_200 = arith.constant 0 : index
    %c0_201 = arith.constant 0 : index
    %c5_202 = arith.constant 5 : index
    %c0_203 = arith.constant 0 : index
    %c0_204 = arith.constant 0 : index
    %178 = vector.load %arg4[%c0_200, %c0_201, %c5_202, %c0_203, %c0_204] : memref<1x4x16x8x128xf32, #tpu.memory_space<vmem>>, vector<1x1x1x8x128xf32>
    %179 = vector.shape_cast %178 : vector<1x1x1x8x128xf32> to vector<8x128xf32>
    %180 = vector.shape_cast %177 : vector<8x128xf32> to vector<1x1x1x8x128xf32>
    tpu.vector_store %arg4[%c0_200, %c0_201, %c5_202, %c0_203, %c0_204], %180 {strides = array<i32>} : memref<1x4x16x8x128xf32, #tpu.memory_space<vmem>>, vector<1x1x1x8x128xf32>,
    %c0_205 = arith.constant 0 : index
    %c1_206 = arith.constant 1 : index
    %c5_207 = arith.constant 5 : index
    %c0_208 = arith.constant 0 : index
    %c0_209 = arith.constant 0 : index
    %181 = vector.load %arg4[%c0_205, %c1_206, %c5_207, %c0_208, %c0_209] : memref<1x4x16x8x128xf32, #tpu.memory_space<vmem>>, vector<1x1x1x8x128xf32>
    %182 = vector.shape_cast %181 : vector<1x1x1x8x128xf32> to vector<8x128xf32>
    %cst_210 = arith.constant 0.000000e+00 : f32
    %183 = vector.broadcast %cst_210 : f32 to vector<2x8x128xf32>
    %184 = arith.select %171, %17, %183 : vector<2x8x128xi1>, vector<2x8x128xf32>
    %cst_211 = arith.constant dense<0.000000e+00> : vector<8x128xf32>
    %185 = vector.multi_reduction <add>, %184, %cst_211 [0] : vector<2x8x128xf32> to vector<8x128xf32>
    %186 = arith.addf %182, %185 : vector<8x128xf32>
    %c0_212 = arith.constant 0 : index
    %c1_213 = arith.constant 1 : index
    %c5_214 = arith.constant 5 : index
    %c0_215 = arith.constant 0 : index
    %c0_216 = arith.constant 0 : index
    %187 = vector.load %arg4[%c0_212, %c1_213, %c5_214, %c0_215, %c0_216] : memref<1x4x16x8x128xf32, #tpu.memory_space<vmem>>, vector<1x1x1x8x128xf32>
    %188 = vector.shape_cast %187 : vector<1x1x1x8x128xf32> to vector<8x128xf32>
    %189 = vector.shape_cast %186 : vector<8x128xf32> to vector<1x1x1x8x128xf32>
    tpu.vector_store %arg4[%c0_212, %c1_213, %c5_214, %c0_215, %c0_216], %189 {strides = array<i32>} : memref<1x4x16x8x128xf32, #tpu.memory_space<vmem>>, vector<1x1x1x8x128xf32>,
    %c0_217 = arith.constant 0 : index
    %c2_218 = arith.constant 2 : index
    %c5_219 = arith.constant 5 : index
    %c0_220 = arith.constant 0 : index
    %c0_221 = arith.constant 0 : index
    %190 = vector.load %arg4[%c0_217, %c2_218, %c5_219, %c0_220, %c0_221] : memref<1x4x16x8x128xf32, #tpu.memory_space<vmem>>, vector<1x1x1x8x128xf32>
    %191 = vector.shape_cast %190 : vector<1x1x1x8x128xf32> to vector<8x128xf32>
    %192 = arith.extui %171 : vector<2x8x128xi1> to vector<2x8x128xi32>
    %193 = arith.sitofp %192 : vector<2x8x128xi32> to vector<2x8x128xf32>
    %cst_222 = arith.constant dense<0.000000e+00> : vector<8x128xf32>
    %194 = vector.multi_reduction <add>, %193, %cst_222 [0] : vector<2x8x128xf32> to vector<8x128xf32>
    %195 = arith.addf %191, %194 : vector<8x128xf32>
    %c0_223 = arith.constant 0 : index
    %c2_224 = arith.constant 2 : index
    %c5_225 = arith.constant 5 : index
    %c0_226 = arith.constant 0 : index
    %c0_227 = arith.constant 0 : index
    %196 = vector.load %arg4[%c0_223, %c2_224, %c5_225, %c0_226, %c0_227] : memref<1x4x16x8x128xf32, #tpu.memory_space<vmem>>, vector<1x1x1x8x128xf32>
    %197 = vector.shape_cast %196 : vector<1x1x1x8x128xf32> to vector<8x128xf32>
    %198 = vector.shape_cast %195 : vector<8x128xf32> to vector<1x1x1x8x128xf32>
    tpu.vector_store %arg4[%c0_223, %c2_224, %c5_225, %c0_226, %c0_227], %198 {strides = array<i32>} : memref<1x4x16x8x128xf32, #tpu.memory_space<vmem>>, vector<1x1x1x8x128xf32>,
    %cst_228 = arith.constant 4.000000e-01 : f32
    %199 = vector.broadcast %cst_228 : f32 to vector<2x8x128xf32>
    %200 = arith.cmpf oge, %16, %199 : vector<2x8x128xf32>
    %c0_229 = arith.constant 0 : index
    %c0_230 = arith.constant 0 : index
    %c6 = arith.constant 6 : index
    %c0_231 = arith.constant 0 : index
    %c0_232 = arith.constant 0 : index
    %201 = vector.load %arg4[%c0_229, %c0_230, %c6, %c0_231, %c0_232] : memref<1x4x16x8x128xf32, #tpu.memory_space<vmem>>, vector<1x1x1x8x128xf32>
    %202 = vector.shape_cast %201 : vector<1x1x1x8x128xf32> to vector<8x128xf32>
    %cst_233 = arith.constant 0.000000e+00 : f32
    %203 = vector.broadcast %cst_233 : f32 to vector<2x8x128xf32>
    %204 = arith.select %200, %16, %203 : vector<2x8x128xi1>, vector<2x8x128xf32>
    %cst_234 = arith.constant dense<0.000000e+00> : vector<8x128xf32>
    %205 = vector.multi_reduction <add>, %204, %cst_234 [0] : vector<2x8x128xf32> to vector<8x128xf32>
    %206 = arith.addf %202, %205 : vector<8x128xf32>
    %c0_235 = arith.constant 0 : index
    %c0_236 = arith.constant 0 : index
    %c6_237 = arith.constant 6 : index
    %c0_238 = arith.constant 0 : index
    %c0_239 = arith.constant 0 : index
    %207 = vector.load %arg4[%c0_235, %c0_236, %c6_237, %c0_238, %c0_239] : memref<1x4x16x8x128xf32, #tpu.memory_space<vmem>>, vector<1x1x1x8x128xf32>
    %208 = vector.shape_cast %207 : vector<1x1x1x8x128xf32> to vector<8x128xf32>
    %209 = vector.shape_cast %206 : vector<8x128xf32> to vector<1x1x1x8x128xf32>
    tpu.vector_store %arg4[%c0_235, %c0_236, %c6_237, %c0_238, %c0_239], %209 {strides = array<i32>} : memref<1x4x16x8x128xf32, #tpu.memory_space<vmem>>, vector<1x1x1x8x128xf32>,
    %c0_240 = arith.constant 0 : index
    %c1_241 = arith.constant 1 : index
    %c6_242 = arith.constant 6 : index
    %c0_243 = arith.constant 0 : index
    %c0_244 = arith.constant 0 : index
    %210 = vector.load %arg4[%c0_240, %c1_241, %c6_242, %c0_243, %c0_244] : memref<1x4x16x8x128xf32, #tpu.memory_space<vmem>>, vector<1x1x1x8x128xf32>
    %211 = vector.shape_cast %210 : vector<1x1x1x8x128xf32> to vector<8x128xf32>
    %cst_245 = arith.constant 0.000000e+00 : f32
    %212 = vector.broadcast %cst_245 : f32 to vector<2x8x128xf32>
    %213 = arith.select %200, %17, %212 : vector<2x8x128xi1>, vector<2x8x128xf32>
    %cst_246 = arith.constant dense<0.000000e+00> : vector<8x128xf32>
    %214 = vector.multi_reduction <add>, %213, %cst_246 [0] : vector<2x8x128xf32> to vector<8x128xf32>
    %215 = arith.addf %211, %214 : vector<8x128xf32>
    %c0_247 = arith.constant 0 : index
    %c1_248 = arith.constant 1 : index
    %c6_249 = arith.constant 6 : index
    %c0_250 = arith.constant 0 : index
    %c0_251 = arith.constant 0 : index
    %216 = vector.load %arg4[%c0_247, %c1_248, %c6_249, %c0_250, %c0_251] : memref<1x4x16x8x128xf32, #tpu.memory_space<vmem>>, vector<1x1x1x8x128xf32>
    %217 = vector.shape_cast %216 : vector<1x1x1x8x128xf32> to vector<8x128xf32>
    %218 = vector.shape_cast %215 : vector<8x128xf32> to vector<1x1x1x8x128xf32>
    tpu.vector_store %arg4[%c0_247, %c1_248, %c6_249, %c0_250, %c0_251], %218 {strides = array<i32>} : memref<1x4x16x8x128xf32, #tpu.memory_space<vmem>>, vector<1x1x1x8x128xf32>,
    %c0_252 = arith.constant 0 : index
    %c2_253 = arith.constant 2 : index
    %c6_254 = arith.constant 6 : index
    %c0_255 = arith.constant 0 : index
    %c0_256 = arith.constant 0 : index
    %219 = vector.load %arg4[%c0_252, %c2_253, %c6_254, %c0_255, %c0_256] : memref<1x4x16x8x128xf32, #tpu.memory_space<vmem>>, vector<1x1x1x8x128xf32>
    %220 = vector.shape_cast %219 : vector<1x1x1x8x128xf32> to vector<8x128xf32>
    %221 = arith.extui %200 : vector<2x8x128xi1> to vector<2x8x128xi32>
    %222 = arith.sitofp %221 : vector<2x8x128xi32> to vector<2x8x128xf32>
    %cst_257 = arith.constant dense<0.000000e+00> : vector<8x128xf32>
    %223 = vector.multi_reduction <add>, %222, %cst_257 [0] : vector<2x8x128xf32> to vector<8x128xf32>
    %224 = arith.addf %220, %223 : vector<8x128xf32>
    %c0_258 = arith.constant 0 : index
    %c2_259 = arith.constant 2 : index
    %c6_260 = arith.constant 6 : index
    %c0_261 = arith.constant 0 : index
    %c0_262 = arith.constant 0 : index
    %225 = vector.load %arg4[%c0_258, %c2_259, %c6_260, %c0_261, %c0_262] : memref<1x4x16x8x128xf32, #tpu.memory_space<vmem>>, vector<1x1x1x8x128xf32>
    %226 = vector.shape_cast %225 : vector<1x1x1x8x128xf32> to vector<8x128xf32>
    %227 = vector.shape_cast %224 : vector<8x128xf32> to vector<1x1x1x8x128xf32>
    tpu.vector_store %arg4[%c0_258, %c2_259, %c6_260, %c0_261, %c0_262], %227 {strides = array<i32>} : memref<1x4x16x8x128xf32, #tpu.memory_space<vmem>>, vector<1x1x1x8x128xf32>,
    %cst_263 = arith.constant 0.466666669 : f32
    %228 = vector.broadcast %cst_263 : f32 to vector<2x8x128xf32>
    %229 = arith.cmpf oge, %16, %228 : vector<2x8x128xf32>
    %c0_264 = arith.constant 0 : index
    %c0_265 = arith.constant 0 : index
    %c7 = arith.constant 7 : index
    %c0_266 = arith.constant 0 : index
    %c0_267 = arith.constant 0 : index
    %230 = vector.load %arg4[%c0_264, %c0_265, %c7, %c0_266, %c0_267] : memref<1x4x16x8x128xf32, #tpu.memory_space<vmem>>, vector<1x1x1x8x128xf32>
    %231 = vector.shape_cast %230 : vector<1x1x1x8x128xf32> to vector<8x128xf32>
    %cst_268 = arith.constant 0.000000e+00 : f32
    %232 = vector.broadcast %cst_268 : f32 to vector<2x8x128xf32>
    %233 = arith.select %229, %16, %232 : vector<2x8x128xi1>, vector<2x8x128xf32>
    %cst_269 = arith.constant dense<0.000000e+00> : vector<8x128xf32>
    %234 = vector.multi_reduction <add>, %233, %cst_269 [0] : vector<2x8x128xf32> to vector<8x128xf32>
    %235 = arith.addf %231, %234 : vector<8x128xf32>
    %c0_270 = arith.constant 0 : index
    %c0_271 = arith.constant 0 : index
    %c7_272 = arith.constant 7 : index
    %c0_273 = arith.constant 0 : index
    %c0_274 = arith.constant 0 : index
    %236 = vector.load %arg4[%c0_270, %c0_271, %c7_272, %c0_273, %c0_274] : memref<1x4x16x8x128xf32, #tpu.memory_space<vmem>>, vector<1x1x1x8x128xf32>
    %237 = vector.shape_cast %236 : vector<1x1x1x8x128xf32> to vector<8x128xf32>
    %238 = vector.shape_cast %235 : vector<8x128xf32> to vector<1x1x1x8x128xf32>
    tpu.vector_store %arg4[%c0_270, %c0_271, %c7_272, %c0_273, %c0_274], %238 {strides = array<i32>} : memref<1x4x16x8x128xf32, #tpu.memory_space<vmem>>, vector<1x1x1x8x128xf32>,
    %c0_275 = arith.constant 0 : index
    %c1_276 = arith.constant 1 : index
    %c7_277 = arith.constant 7 : index
    %c0_278 = arith.constant 0 : index
    %c0_279 = arith.constant 0 : index
    %239 = vector.load %arg4[%c0_275, %c1_276, %c7_277, %c0_278, %c0_279] : memref<1x4x16x8x128xf32, #tpu.memory_space<vmem>>, vector<1x1x1x8x128xf32>
    %240 = vector.shape_cast %239 : vector<1x1x1x8x128xf32> to vector<8x128xf32>
    %cst_280 = arith.constant 0.000000e+00 : f32
    %241 = vector.broadcast %cst_280 : f32 to vector<2x8x128xf32>
    %242 = arith.select %229, %17, %241 : vector<2x8x128xi1>, vector<2x8x128xf32>
    %cst_281 = arith.constant dense<0.000000e+00> : vector<8x128xf32>
    %243 = vector.multi_reduction <add>, %242, %cst_281 [0] : vector<2x8x128xf32> to vector<8x128xf32>
    %244 = arith.addf %240, %243 : vector<8x128xf32>
    %c0_282 = arith.constant 0 : index
    %c1_283 = arith.constant 1 : index
    %c7_284 = arith.constant 7 : index
    %c0_285 = arith.constant 0 : index
    %c0_286 = arith.constant 0 : index
    %245 = vector.load %arg4[%c0_282, %c1_283, %c7_284, %c0_285, %c0_286] : memref<1x4x16x8x128xf32, #tpu.memory_space<vmem>>, vector<1x1x1x8x128xf32>
    %246 = vector.shape_cast %245 : vector<1x1x1x8x128xf32> to vector<8x128xf32>
    %247 = vector.shape_cast %244 : vector<8x128xf32> to vector<1x1x1x8x128xf32>
    tpu.vector_store %arg4[%c0_282, %c1_283, %c7_284, %c0_285, %c0_286], %247 {strides = array<i32>} : memref<1x4x16x8x128xf32, #tpu.memory_space<vmem>>, vector<1x1x1x8x128xf32>,
    %c0_287 = arith.constant 0 : index
    %c2_288 = arith.constant 2 : index
    %c7_289 = arith.constant 7 : index
    %c0_290 = arith.constant 0 : index
    %c0_291 = arith.constant 0 : index
    %248 = vector.load %arg4[%c0_287, %c2_288, %c7_289, %c0_290, %c0_291] : memref<1x4x16x8x128xf32, #tpu.memory_space<vmem>>, vector<1x1x1x8x128xf32>
    %249 = vector.shape_cast %248 : vector<1x1x1x8x128xf32> to vector<8x128xf32>
    %250 = arith.extui %229 : vector<2x8x128xi1> to vector<2x8x128xi32>
    %251 = arith.sitofp %250 : vector<2x8x128xi32> to vector<2x8x128xf32>
    %cst_292 = arith.constant dense<0.000000e+00> : vector<8x128xf32>
    %252 = vector.multi_reduction <add>, %251, %cst_292 [0] : vector<2x8x128xf32> to vector<8x128xf32>
    %253 = arith.addf %249, %252 : vector<8x128xf32>
    %c0_293 = arith.constant 0 : index
    %c2_294 = arith.constant 2 : index
    %c7_295 = arith.constant 7 : index
    %c0_296 = arith.constant 0 : index
    %c0_297 = arith.constant 0 : index
    %254 = vector.load %arg4[%c0_293, %c2_294, %c7_295, %c0_296, %c0_297] : memref<1x4x16x8x128xf32, #tpu.memory_space<vmem>>, vector<1x1x1x8x128xf32>
    %255 = vector.shape_cast %254 : vector<1x1x1x8x128xf32> to vector<8x128xf32>
    %256 = vector.shape_cast %253 : vector<8x128xf32> to vector<1x1x1x8x128xf32>
    tpu.vector_store %arg4[%c0_293, %c2_294, %c7_295, %c0_296, %c0_297], %256 {strides = array<i32>} : memref<1x4x16x8x128xf32, #tpu.memory_space<vmem>>, vector<1x1x1x8x128xf32>,
    %cst_298 = arith.constant 0.533333361 : f32
    %257 = vector.broadcast %cst_298 : f32 to vector<2x8x128xf32>
    %258 = arith.cmpf oge, %16, %257 : vector<2x8x128xf32>
    %c0_299 = arith.constant 0 : index
    %c0_300 = arith.constant 0 : index
    %c8 = arith.constant 8 : index
    %c0_301 = arith.constant 0 : index
    %c0_302 = arith.constant 0 : index
    %259 = vector.load %arg4[%c0_299, %c0_300, %c8, %c0_301, %c0_302] : memref<1x4x16x8x128xf32, #tpu.memory_space<vmem>>, vector<1x1x1x8x128xf32>
    %260 = vector.shape_cast %259 : vector<1x1x1x8x128xf32> to vector<8x128xf32>
    %cst_303 = arith.constant 0.000000e+00 : f32
    %261 = vector.broadcast %cst_303 : f32 to vector<2x8x128xf32>
    %262 = arith.select %258, %16, %261 : vector<2x8x128xi1>, vector<2x8x128xf32>
    %cst_304 = arith.constant dense<0.000000e+00> : vector<8x128xf32>
    %263 = vector.multi_reduction <add>, %262, %cst_304 [0] : vector<2x8x128xf32> to vector<8x128xf32>
    %264 = arith.addf %260, %263 : vector<8x128xf32>
    %c0_305 = arith.constant 0 : index
    %c0_306 = arith.constant 0 : index
    %c8_307 = arith.constant 8 : index
    %c0_308 = arith.constant 0 : index
    %c0_309 = arith.constant 0 : index
    %265 = vector.load %arg4[%c0_305, %c0_306, %c8_307, %c0_308, %c0_309] : memref<1x4x16x8x128xf32, #tpu.memory_space<vmem>>, vector<1x1x1x8x128xf32>
    %266 = vector.shape_cast %265 : vector<1x1x1x8x128xf32> to vector<8x128xf32>
    %267 = vector.shape_cast %264 : vector<8x128xf32> to vector<1x1x1x8x128xf32>
    tpu.vector_store %arg4[%c0_305, %c0_306, %c8_307, %c0_308, %c0_309], %267 {strides = array<i32>} : memref<1x4x16x8x128xf32, #tpu.memory_space<vmem>>, vector<1x1x1x8x128xf32>,
    %c0_310 = arith.constant 0 : index
    %c1_311 = arith.constant 1 : index
    %c8_312 = arith.constant 8 : index
    %c0_313 = arith.constant 0 : index
    %c0_314 = arith.constant 0 : index
    %268 = vector.load %arg4[%c0_310, %c1_311, %c8_312, %c0_313, %c0_314] : memref<1x4x16x8x128xf32, #tpu.memory_space<vmem>>, vector<1x1x1x8x128xf32>
    %269 = vector.shape_cast %268 : vector<1x1x1x8x128xf32> to vector<8x128xf32>
    %cst_315 = arith.constant 0.000000e+00 : f32
    %270 = vector.broadcast %cst_315 : f32 to vector<2x8x128xf32>
    %271 = arith.select %258, %17, %270 : vector<2x8x128xi1>, vector<2x8x128xf32>
    %cst_316 = arith.constant dense<0.000000e+00> : vector<8x128xf32>
    %272 = vector.multi_reduction <add>, %271, %cst_316 [0] : vector<2x8x128xf32> to vector<8x128xf32>
    %273 = arith.addf %269, %272 : vector<8x128xf32>
    %c0_317 = arith.constant 0 : index
    %c1_318 = arith.constant 1 : index
    %c8_319 = arith.constant 8 : index
    %c0_320 = arith.constant 0 : index
    %c0_321 = arith.constant 0 : index
    %274 = vector.load %arg4[%c0_317, %c1_318, %c8_319, %c0_320, %c0_321] : memref<1x4x16x8x128xf32, #tpu.memory_space<vmem>>, vector<1x1x1x8x128xf32>
    %275 = vector.shape_cast %274 : vector<1x1x1x8x128xf32> to vector<8x128xf32>
    %276 = vector.shape_cast %273 : vector<8x128xf32> to vector<1x1x1x8x128xf32>
    tpu.vector_store %arg4[%c0_317, %c1_318, %c8_319, %c0_320, %c0_321], %276 {strides = array<i32>} : memref<1x4x16x8x128xf32, #tpu.memory_space<vmem>>, vector<1x1x1x8x128xf32>,
    %c0_322 = arith.constant 0 : index
    %c2_323 = arith.constant 2 : index
    %c8_324 = arith.constant 8 : index
    %c0_325 = arith.constant 0 : index
    %c0_326 = arith.constant 0 : index
    %277 = vector.load %arg4[%c0_322, %c2_323, %c8_324, %c0_325, %c0_326] : memref<1x4x16x8x128xf32, #tpu.memory_space<vmem>>, vector<1x1x1x8x128xf32>
    %278 = vector.shape_cast %277 : vector<1x1x1x8x128xf32> to vector<8x128xf32>
    %279 = arith.extui %258 : vector<2x8x128xi1> to vector<2x8x128xi32>
    %280 = arith.sitofp %279 : vector<2x8x128xi32> to vector<2x8x128xf32>
    %cst_327 = arith.constant dense<0.000000e+00> : vector<8x128xf32>
    %281 = vector.multi_reduction <add>, %280, %cst_327 [0] : vector<2x8x128xf32> to vector<8x128xf32>
    %282 = arith.addf %278, %281 : vector<8x128xf32>
    %c0_328 = arith.constant 0 : index
    %c2_329 = arith.constant 2 : index
    %c8_330 = arith.constant 8 : index
    %c0_331 = arith.constant 0 : index
    %c0_332 = arith.constant 0 : index
    %283 = vector.load %arg4[%c0_328, %c2_329, %c8_330, %c0_331, %c0_332] : memref<1x4x16x8x128xf32, #tpu.memory_space<vmem>>, vector<1x1x1x8x128xf32>
    %284 = vector.shape_cast %283 : vector<1x1x1x8x128xf32> to vector<8x128xf32>
    %285 = vector.shape_cast %282 : vector<8x128xf32> to vector<1x1x1x8x128xf32>
    tpu.vector_store %arg4[%c0_328, %c2_329, %c8_330, %c0_331, %c0_332], %285 {strides = array<i32>} : memref<1x4x16x8x128xf32, #tpu.memory_space<vmem>>, vector<1x1x1x8x128xf32>,
    %cst_333 = arith.constant 6.000000e-01 : f32
    %286 = vector.broadcast %cst_333 : f32 to vector<2x8x128xf32>
    %287 = arith.cmpf oge, %16, %286 : vector<2x8x128xf32>
    %c0_334 = arith.constant 0 : index
    %c0_335 = arith.constant 0 : index
    %c9 = arith.constant 9 : index
    %c0_336 = arith.constant 0 : index
    %c0_337 = arith.constant 0 : index
    %288 = vector.load %arg4[%c0_334, %c0_335, %c9, %c0_336, %c0_337] : memref<1x4x16x8x128xf32, #tpu.memory_space<vmem>>, vector<1x1x1x8x128xf32>
    %289 = vector.shape_cast %288 : vector<1x1x1x8x128xf32> to vector<8x128xf32>
    %cst_338 = arith.constant 0.000000e+00 : f32
    %290 = vector.broadcast %cst_338 : f32 to vector<2x8x128xf32>
    %291 = arith.select %287, %16, %290 : vector<2x8x128xi1>, vector<2x8x128xf32>
    %cst_339 = arith.constant dense<0.000000e+00> : vector<8x128xf32>
    %292 = vector.multi_reduction <add>, %291, %cst_339 [0] : vector<2x8x128xf32> to vector<8x128xf32>
    %293 = arith.addf %289, %292 : vector<8x128xf32>
    %c0_340 = arith.constant 0 : index
    %c0_341 = arith.constant 0 : index
    %c9_342 = arith.constant 9 : index
    %c0_343 = arith.constant 0 : index
    %c0_344 = arith.constant 0 : index
    %294 = vector.load %arg4[%c0_340, %c0_341, %c9_342, %c0_343, %c0_344] : memref<1x4x16x8x128xf32, #tpu.memory_space<vmem>>, vector<1x1x1x8x128xf32>
    %295 = vector.shape_cast %294 : vector<1x1x1x8x128xf32> to vector<8x128xf32>
    %296 = vector.shape_cast %293 : vector<8x128xf32> to vector<1x1x1x8x128xf32>
    tpu.vector_store %arg4[%c0_340, %c0_341, %c9_342, %c0_343, %c0_344], %296 {strides = array<i32>} : memref<1x4x16x8x128xf32, #tpu.memory_space<vmem>>, vector<1x1x1x8x128xf32>,
    %c0_345 = arith.constant 0 : index
    %c1_346 = arith.constant 1 : index
    %c9_347 = arith.constant 9 : index
    %c0_348 = arith.constant 0 : index
    %c0_349 = arith.constant 0 : index
    %297 = vector.load %arg4[%c0_345, %c1_346, %c9_347, %c0_348, %c0_349] : memref<1x4x16x8x128xf32, #tpu.memory_space<vmem>>, vector<1x1x1x8x128xf32>
    %298 = vector.shape_cast %297 : vector<1x1x1x8x128xf32> to vector<8x128xf32>
    %cst_350 = arith.constant 0.000000e+00 : f32
    %299 = vector.broadcast %cst_350 : f32 to vector<2x8x128xf32>
    %300 = arith.select %287, %17, %299 : vector<2x8x128xi1>, vector<2x8x128xf32>
    %cst_351 = arith.constant dense<0.000000e+00> : vector<8x128xf32>
    %301 = vector.multi_reduction <add>, %300, %cst_351 [0] : vector<2x8x128xf32> to vector<8x128xf32>
    %302 = arith.addf %298, %301 : vector<8x128xf32>
    %c0_352 = arith.constant 0 : index
    %c1_353 = arith.constant 1 : index
    %c9_354 = arith.constant 9 : index
    %c0_355 = arith.constant 0 : index
    %c0_356 = arith.constant 0 : index
    %303 = vector.load %arg4[%c0_352, %c1_353, %c9_354, %c0_355, %c0_356] : memref<1x4x16x8x128xf32, #tpu.memory_space<vmem>>, vector<1x1x1x8x128xf32>
    %304 = vector.shape_cast %303 : vector<1x1x1x8x128xf32> to vector<8x128xf32>
    %305 = vector.shape_cast %302 : vector<8x128xf32> to vector<1x1x1x8x128xf32>
    tpu.vector_store %arg4[%c0_352, %c1_353, %c9_354, %c0_355, %c0_356], %305 {strides = array<i32>} : memref<1x4x16x8x128xf32, #tpu.memory_space<vmem>>, vector<1x1x1x8x128xf32>,
    %c0_357 = arith.constant 0 : index
    %c2_358 = arith.constant 2 : index
    %c9_359 = arith.constant 9 : index
    %c0_360 = arith.constant 0 : index
    %c0_361 = arith.constant 0 : index
    %306 = vector.load %arg4[%c0_357, %c2_358, %c9_359, %c0_360, %c0_361] : memref<1x4x16x8x128xf32, #tpu.memory_space<vmem>>, vector<1x1x1x8x128xf32>
    %307 = vector.shape_cast %306 : vector<1x1x1x8x128xf32> to vector<8x128xf32>
    %308 = arith.extui %287 : vector<2x8x128xi1> to vector<2x8x128xi32>
    %309 = arith.sitofp %308 : vector<2x8x128xi32> to vector<2x8x128xf32>
    %cst_362 = arith.constant dense<0.000000e+00> : vector<8x128xf32>
    %310 = vector.multi_reduction <add>, %309, %cst_362 [0] : vector<2x8x128xf32> to vector<8x128xf32>
    %311 = arith.addf %307, %310 : vector<8x128xf32>
    %c0_363 = arith.constant 0 : index
    %c2_364 = arith.constant 2 : index
    %c9_365 = arith.constant 9 : index
    %c0_366 = arith.constant 0 : index
    %c0_367 = arith.constant 0 : index
    %312 = vector.load %arg4[%c0_363, %c2_364, %c9_365, %c0_366, %c0_367] : memref<1x4x16x8x128xf32, #tpu.memory_space<vmem>>, vector<1x1x1x8x128xf32>
    %313 = vector.shape_cast %312 : vector<1x1x1x8x128xf32> to vector<8x128xf32>
    %314 = vector.shape_cast %311 : vector<8x128xf32> to vector<1x1x1x8x128xf32>
    tpu.vector_store %arg4[%c0_363, %c2_364, %c9_365, %c0_366, %c0_367], %314 {strides = array<i32>} : memref<1x4x16x8x128xf32, #tpu.memory_space<vmem>>, vector<1x1x1x8x128xf32>,
    %cst_368 = arith.constant 0.666666686 : f32
    %315 = vector.broadcast %cst_368 : f32 to vector<2x8x128xf32>
    %316 = arith.cmpf oge, %16, %315 : vector<2x8x128xf32>
    %c0_369 = arith.constant 0 : index
    %c0_370 = arith.constant 0 : index
    %c10 = arith.constant 10 : index
    %c0_371 = arith.constant 0 : index
    %c0_372 = arith.constant 0 : index
    %317 = vector.load %arg4[%c0_369, %c0_370, %c10, %c0_371, %c0_372] : memref<1x4x16x8x128xf32, #tpu.memory_space<vmem>>, vector<1x1x1x8x128xf32>
    %318 = vector.shape_cast %317 : vector<1x1x1x8x128xf32> to vector<8x128xf32>
    %cst_373 = arith.constant 0.000000e+00 : f32
    %319 = vector.broadcast %cst_373 : f32 to vector<2x8x128xf32>
    %320 = arith.select %316, %16, %319 : vector<2x8x128xi1>, vector<2x8x128xf32>
    %cst_374 = arith.constant dense<0.000000e+00> : vector<8x128xf32>
    %321 = vector.multi_reduction <add>, %320, %cst_374 [0] : vector<2x8x128xf32> to vector<8x128xf32>
    %322 = arith.addf %318, %321 : vector<8x128xf32>
    %c0_375 = arith.constant 0 : index
    %c0_376 = arith.constant 0 : index
    %c10_377 = arith.constant 10 : index
    %c0_378 = arith.constant 0 : index
    %c0_379 = arith.constant 0 : index
    %323 = vector.load %arg4[%c0_375, %c0_376, %c10_377, %c0_378, %c0_379] : memref<1x4x16x8x128xf32, #tpu.memory_space<vmem>>, vector<1x1x1x8x128xf32>
    %324 = vector.shape_cast %323 : vector<1x1x1x8x128xf32> to vector<8x128xf32>
    %325 = vector.shape_cast %322 : vector<8x128xf32> to vector<1x1x1x8x128xf32>
    tpu.vector_store %arg4[%c0_375, %c0_376, %c10_377, %c0_378, %c0_379], %325 {strides = array<i32>} : memref<1x4x16x8x128xf32, #tpu.memory_space<vmem>>, vector<1x1x1x8x128xf32>,
    %c0_380 = arith.constant 0 : index
    %c1_381 = arith.constant 1 : index
    %c10_382 = arith.constant 10 : index
    %c0_383 = arith.constant 0 : index
    %c0_384 = arith.constant 0 : index
    %326 = vector.load %arg4[%c0_380, %c1_381, %c10_382, %c0_383, %c0_384] : memref<1x4x16x8x128xf32, #tpu.memory_space<vmem>>, vector<1x1x1x8x128xf32>
    %327 = vector.shape_cast %326 : vector<1x1x1x8x128xf32> to vector<8x128xf32>
    %cst_385 = arith.constant 0.000000e+00 : f32
    %328 = vector.broadcast %cst_385 : f32 to vector<2x8x128xf32>
    %329 = arith.select %316, %17, %328 : vector<2x8x128xi1>, vector<2x8x128xf32>
    %cst_386 = arith.constant dense<0.000000e+00> : vector<8x128xf32>
    %330 = vector.multi_reduction <add>, %329, %cst_386 [0] : vector<2x8x128xf32> to vector<8x128xf32>
    %331 = arith.addf %327, %330 : vector<8x128xf32>
    %c0_387 = arith.constant 0 : index
    %c1_388 = arith.constant 1 : index
    %c10_389 = arith.constant 10 : index
    %c0_390 = arith.constant 0 : index
    %c0_391 = arith.constant 0 : index
    %332 = vector.load %arg4[%c0_387, %c1_388, %c10_389, %c0_390, %c0_391] : memref<1x4x16x8x128xf32, #tpu.memory_space<vmem>>, vector<1x1x1x8x128xf32>
    %333 = vector.shape_cast %332 : vector<1x1x1x8x128xf32> to vector<8x128xf32>
    %334 = vector.shape_cast %331 : vector<8x128xf32> to vector<1x1x1x8x128xf32>
    tpu.vector_store %arg4[%c0_387, %c1_388, %c10_389, %c0_390, %c0_391], %334 {strides = array<i32>} : memref<1x4x16x8x128xf32, #tpu.memory_space<vmem>>, vector<1x1x1x8x128xf32>,
    %c0_392 = arith.constant 0 : index
    %c2_393 = arith.constant 2 : index
    %c10_394 = arith.constant 10 : index
    %c0_395 = arith.constant 0 : index
    %c0_396 = arith.constant 0 : index
    %335 = vector.load %arg4[%c0_392, %c2_393, %c10_394, %c0_395, %c0_396] : memref<1x4x16x8x128xf32, #tpu.memory_space<vmem>>, vector<1x1x1x8x128xf32>
    %336 = vector.shape_cast %335 : vector<1x1x1x8x128xf32> to vector<8x128xf32>
    %337 = arith.extui %316 : vector<2x8x128xi1> to vector<2x8x128xi32>
    %338 = arith.sitofp %337 : vector<2x8x128xi32> to vector<2x8x128xf32>
    %cst_397 = arith.constant dense<0.000000e+00> : vector<8x128xf32>
    %339 = vector.multi_reduction <add>, %338, %cst_397 [0] : vector<2x8x128xf32> to vector<8x128xf32>
    %340 = arith.addf %336, %339 : vector<8x128xf32>
    %c0_398 = arith.constant 0 : index
    %c2_399 = arith.constant 2 : index
    %c10_400 = arith.constant 10 : index
    %c0_401 = arith.constant 0 : index
    %c0_402 = arith.constant 0 : index
    %341 = vector.load %arg4[%c0_398, %c2_399, %c10_400, %c0_401, %c0_402] : memref<1x4x16x8x128xf32, #tpu.memory_space<vmem>>, vector<1x1x1x8x128xf32>
    %342 = vector.shape_cast %341 : vector<1x1x1x8x128xf32> to vector<8x128xf32>
    %343 = vector.shape_cast %340 : vector<8x128xf32> to vector<1x1x1x8x128xf32>
    tpu.vector_store %arg4[%c0_398, %c2_399, %c10_400, %c0_401, %c0_402], %343 {strides = array<i32>} : memref<1x4x16x8x128xf32, #tpu.memory_space<vmem>>, vector<1x1x1x8x128xf32>,
    %cst_403 = arith.constant 0.733333349 : f32
    %344 = vector.broadcast %cst_403 : f32 to vector<2x8x128xf32>
    %345 = arith.cmpf oge, %16, %344 : vector<2x8x128xf32>
    %c0_404 = arith.constant 0 : index
    %c0_405 = arith.constant 0 : index
    %c11 = arith.constant 11 : index
    %c0_406 = arith.constant 0 : index
    %c0_407 = arith.constant 0 : index
    %346 = vector.load %arg4[%c0_404, %c0_405, %c11, %c0_406, %c0_407] : memref<1x4x16x8x128xf32, #tpu.memory_space<vmem>>, vector<1x1x1x8x128xf32>
    %347 = vector.shape_cast %346 : vector<1x1x1x8x128xf32> to vector<8x128xf32>
    %cst_408 = arith.constant 0.000000e+00 : f32
    %348 = vector.broadcast %cst_408 : f32 to vector<2x8x128xf32>
    %349 = arith.select %345, %16, %348 : vector<2x8x128xi1>, vector<2x8x128xf32>
    %cst_409 = arith.constant dense<0.000000e+00> : vector<8x128xf32>
    %350 = vector.multi_reduction <add>, %349, %cst_409 [0] : vector<2x8x128xf32> to vector<8x128xf32>
    %351 = arith.addf %347, %350 : vector<8x128xf32>
    %c0_410 = arith.constant 0 : index
    %c0_411 = arith.constant 0 : index
    %c11_412 = arith.constant 11 : index
    %c0_413 = arith.constant 0 : index
    %c0_414 = arith.constant 0 : index
    %352 = vector.load %arg4[%c0_410, %c0_411, %c11_412, %c0_413, %c0_414] : memref<1x4x16x8x128xf32, #tpu.memory_space<vmem>>, vector<1x1x1x8x128xf32>
    %353 = vector.shape_cast %352 : vector<1x1x1x8x128xf32> to vector<8x128xf32>
    %354 = vector.shape_cast %351 : vector<8x128xf32> to vector<1x1x1x8x128xf32>
    tpu.vector_store %arg4[%c0_410, %c0_411, %c11_412, %c0_413, %c0_414], %354 {strides = array<i32>} : memref<1x4x16x8x128xf32, #tpu.memory_space<vmem>>, vector<1x1x1x8x128xf32>,
    %c0_415 = arith.constant 0 : index
    %c1_416 = arith.constant 1 : index
    %c11_417 = arith.constant 11 : index
    %c0_418 = arith.constant 0 : index
    %c0_419 = arith.constant 0 : index
    %355 = vector.load %arg4[%c0_415, %c1_416, %c11_417, %c0_418, %c0_419] : memref<1x4x16x8x128xf32, #tpu.memory_space<vmem>>, vector<1x1x1x8x128xf32>
    %356 = vector.shape_cast %355 : vector<1x1x1x8x128xf32> to vector<8x128xf32>
    %cst_420 = arith.constant 0.000000e+00 : f32
    %357 = vector.broadcast %cst_420 : f32 to vector<2x8x128xf32>
    %358 = arith.select %345, %17, %357 : vector<2x8x128xi1>, vector<2x8x128xf32>
    %cst_421 = arith.constant dense<0.000000e+00> : vector<8x128xf32>
    %359 = vector.multi_reduction <add>, %358, %cst_421 [0] : vector<2x8x128xf32> to vector<8x128xf32>
    %360 = arith.addf %356, %359 : vector<8x128xf32>
    %c0_422 = arith.constant 0 : index
    %c1_423 = arith.constant 1 : index
    %c11_424 = arith.constant 11 : index
    %c0_425 = arith.constant 0 : index
    %c0_426 = arith.constant 0 : index
    %361 = vector.load %arg4[%c0_422, %c1_423, %c11_424, %c0_425, %c0_426] : memref<1x4x16x8x128xf32, #tpu.memory_space<vmem>>, vector<1x1x1x8x128xf32>
    %362 = vector.shape_cast %361 : vector<1x1x1x8x128xf32> to vector<8x128xf32>
    %363 = vector.shape_cast %360 : vector<8x128xf32> to vector<1x1x1x8x128xf32>
    tpu.vector_store %arg4[%c0_422, %c1_423, %c11_424, %c0_425, %c0_426], %363 {strides = array<i32>} : memref<1x4x16x8x128xf32, #tpu.memory_space<vmem>>, vector<1x1x1x8x128xf32>,
    %c0_427 = arith.constant 0 : index
    %c2_428 = arith.constant 2 : index
    %c11_429 = arith.constant 11 : index
    %c0_430 = arith.constant 0 : index
    %c0_431 = arith.constant 0 : index
    %364 = vector.load %arg4[%c0_427, %c2_428, %c11_429, %c0_430, %c0_431] : memref<1x4x16x8x128xf32, #tpu.memory_space<vmem>>, vector<1x1x1x8x128xf32>
    %365 = vector.shape_cast %364 : vector<1x1x1x8x128xf32> to vector<8x128xf32>
    %366 = arith.extui %345 : vector<2x8x128xi1> to vector<2x8x128xi32>
    %367 = arith.sitofp %366 : vector<2x8x128xi32> to vector<2x8x128xf32>
    %cst_432 = arith.constant dense<0.000000e+00> : vector<8x128xf32>
    %368 = vector.multi_reduction <add>, %367, %cst_432 [0] : vector<2x8x128xf32> to vector<8x128xf32>
    %369 = arith.addf %365, %368 : vector<8x128xf32>
    %c0_433 = arith.constant 0 : index
    %c2_434 = arith.constant 2 : index
    %c11_435 = arith.constant 11 : index
    %c0_436 = arith.constant 0 : index
    %c0_437 = arith.constant 0 : index
    %370 = vector.load %arg4[%c0_433, %c2_434, %c11_435, %c0_436, %c0_437] : memref<1x4x16x8x128xf32, #tpu.memory_space<vmem>>, vector<1x1x1x8x128xf32>
    %371 = vector.shape_cast %370 : vector<1x1x1x8x128xf32> to vector<8x128xf32>
    %372 = vector.shape_cast %369 : vector<8x128xf32> to vector<1x1x1x8x128xf32>
    tpu.vector_store %arg4[%c0_433, %c2_434, %c11_435, %c0_436, %c0_437], %372 {strides = array<i32>} : memref<1x4x16x8x128xf32, #tpu.memory_space<vmem>>, vector<1x1x1x8x128xf32>,
    %cst_438 = arith.constant 8.000000e-01 : f32
    %373 = vector.broadcast %cst_438 : f32 to vector<2x8x128xf32>
    %374 = arith.cmpf oge, %16, %373 : vector<2x8x128xf32>
    %c0_439 = arith.constant 0 : index
    %c0_440 = arith.constant 0 : index
    %c12 = arith.constant 12 : index
    %c0_441 = arith.constant 0 : index
    %c0_442 = arith.constant 0 : index
    %375 = vector.load %arg4[%c0_439, %c0_440, %c12, %c0_441, %c0_442] : memref<1x4x16x8x128xf32, #tpu.memory_space<vmem>>, vector<1x1x1x8x128xf32>
    %376 = vector.shape_cast %375 : vector<1x1x1x8x128xf32> to vector<8x128xf32>
    %cst_443 = arith.constant 0.000000e+00 : f32
    %377 = vector.broadcast %cst_443 : f32 to vector<2x8x128xf32>
    %378 = arith.select %374, %16, %377 : vector<2x8x128xi1>, vector<2x8x128xf32>
    %cst_444 = arith.constant dense<0.000000e+00> : vector<8x128xf32>
    %379 = vector.multi_reduction <add>, %378, %cst_444 [0] : vector<2x8x128xf32> to vector<8x128xf32>
    %380 = arith.addf %376, %379 : vector<8x128xf32>
    %c0_445 = arith.constant 0 : index
    %c0_446 = arith.constant 0 : index
    %c12_447 = arith.constant 12 : index
    %c0_448 = arith.constant 0 : index
    %c0_449 = arith.constant 0 : index
    %381 = vector.load %arg4[%c0_445, %c0_446, %c12_447, %c0_448, %c0_449] : memref<1x4x16x8x128xf32, #tpu.memory_space<vmem>>, vector<1x1x1x8x128xf32>
    %382 = vector.shape_cast %381 : vector<1x1x1x8x128xf32> to vector<8x128xf32>
    %383 = vector.shape_cast %380 : vector<8x128xf32> to vector<1x1x1x8x128xf32>
    tpu.vector_store %arg4[%c0_445, %c0_446, %c12_447, %c0_448, %c0_449], %383 {strides = array<i32>} : memref<1x4x16x8x128xf32, #tpu.memory_space<vmem>>, vector<1x1x1x8x128xf32>,
    %c0_450 = arith.constant 0 : index
    %c1_451 = arith.constant 1 : index
    %c12_452 = arith.constant 12 : index
    %c0_453 = arith.constant 0 : index
    %c0_454 = arith.constant 0 : index
    %384 = vector.load %arg4[%c0_450, %c1_451, %c12_452, %c0_453, %c0_454] : memref<1x4x16x8x128xf32, #tpu.memory_space<vmem>>, vector<1x1x1x8x128xf32>
    %385 = vector.shape_cast %384 : vector<1x1x1x8x128xf32> to vector<8x128xf32>
    %cst_455 = arith.constant 0.000000e+00 : f32
    %386 = vector.broadcast %cst_455 : f32 to vector<2x8x128xf32>
    %387 = arith.select %374, %17, %386 : vector<2x8x128xi1>, vector<2x8x128xf32>
    %cst_456 = arith.constant dense<0.000000e+00> : vector<8x128xf32>
    %388 = vector.multi_reduction <add>, %387, %cst_456 [0] : vector<2x8x128xf32> to vector<8x128xf32>
    %389 = arith.addf %385, %388 : vector<8x128xf32>
    %c0_457 = arith.constant 0 : index
    %c1_458 = arith.constant 1 : index
    %c12_459 = arith.constant 12 : index
    %c0_460 = arith.constant 0 : index
    %c0_461 = arith.constant 0 : index
    %390 = vector.load %arg4[%c0_457, %c1_458, %c12_459, %c0_460, %c0_461] : memref<1x4x16x8x128xf32, #tpu.memory_space<vmem>>, vector<1x1x1x8x128xf32>
    %391 = vector.shape_cast %390 : vector<1x1x1x8x128xf32> to vector<8x128xf32>
    %392 = vector.shape_cast %389 : vector<8x128xf32> to vector<1x1x1x8x128xf32>
    tpu.vector_store %arg4[%c0_457, %c1_458, %c12_459, %c0_460, %c0_461], %392 {strides = array<i32>} : memref<1x4x16x8x128xf32, #tpu.memory_space<vmem>>, vector<1x1x1x8x128xf32>,
    %c0_462 = arith.constant 0 : index
    %c2_463 = arith.constant 2 : index
    %c12_464 = arith.constant 12 : index
    %c0_465 = arith.constant 0 : index
    %c0_466 = arith.constant 0 : index
    %393 = vector.load %arg4[%c0_462, %c2_463, %c12_464, %c0_465, %c0_466] : memref<1x4x16x8x128xf32, #tpu.memory_space<vmem>>, vector<1x1x1x8x128xf32>
    %394 = vector.shape_cast %393 : vector<1x1x1x8x128xf32> to vector<8x128xf32>
    %395 = arith.extui %374 : vector<2x8x128xi1> to vector<2x8x128xi32>
    %396 = arith.sitofp %395 : vector<2x8x128xi32> to vector<2x8x128xf32>
    %cst_467 = arith.constant dense<0.000000e+00> : vector<8x128xf32>
    %397 = vector.multi_reduction <add>, %396, %cst_467 [0] : vector<2x8x128xf32> to vector<8x128xf32>
    %398 = arith.addf %394, %397 : vector<8x128xf32>
    %c0_468 = arith.constant 0 : index
    %c2_469 = arith.constant 2 : index
    %c12_470 = arith.constant 12 : index
    %c0_471 = arith.constant 0 : index
    %c0_472 = arith.constant 0 : index
    %399 = vector.load %arg4[%c0_468, %c2_469, %c12_470, %c0_471, %c0_472] : memref<1x4x16x8x128xf32, #tpu.memory_space<vmem>>, vector<1x1x1x8x128xf32>
    %400 = vector.shape_cast %399 : vector<1x1x1x8x128xf32> to vector<8x128xf32>
    %401 = vector.shape_cast %398 : vector<8x128xf32> to vector<1x1x1x8x128xf32>
    tpu.vector_store %arg4[%c0_468, %c2_469, %c12_470, %c0_471, %c0_472], %401 {strides = array<i32>} : memref<1x4x16x8x128xf32, #tpu.memory_space<vmem>>, vector<1x1x1x8x128xf32>,
    %cst_473 = arith.constant 0.866666674 : f32
    %402 = vector.broadcast %cst_473 : f32 to vector<2x8x128xf32>
    %403 = arith.cmpf oge, %16, %402 : vector<2x8x128xf32>
    %c0_474 = arith.constant 0 : index
    %c0_475 = arith.constant 0 : index
    %c13 = arith.constant 13 : index
    %c0_476 = arith.constant 0 : index
    %c0_477 = arith.constant 0 : index
    %404 = vector.load %arg4[%c0_474, %c0_475, %c13, %c0_476, %c0_477] : memref<1x4x16x8x128xf32, #tpu.memory_space<vmem>>, vector<1x1x1x8x128xf32>
    %405 = vector.shape_cast %404 : vector<1x1x1x8x128xf32> to vector<8x128xf32>
    %cst_478 = arith.constant 0.000000e+00 : f32
    %406 = vector.broadcast %cst_478 : f32 to vector<2x8x128xf32>
    %407 = arith.select %403, %16, %406 : vector<2x8x128xi1>, vector<2x8x128xf32>
    %cst_479 = arith.constant dense<0.000000e+00> : vector<8x128xf32>
    %408 = vector.multi_reduction <add>, %407, %cst_479 [0] : vector<2x8x128xf32> to vector<8x128xf32>
    %409 = arith.addf %405, %408 : vector<8x128xf32>
    %c0_480 = arith.constant 0 : index
    %c0_481 = arith.constant 0 : index
    %c13_482 = arith.constant 13 : index
    %c0_483 = arith.constant 0 : index
    %c0_484 = arith.constant 0 : index
    %410 = vector.load %arg4[%c0_480, %c0_481, %c13_482, %c0_483, %c0_484] : memref<1x4x16x8x128xf32, #tpu.memory_space<vmem>>, vector<1x1x1x8x128xf32>
    %411 = vector.shape_cast %410 : vector<1x1x1x8x128xf32> to vector<8x128xf32>
    %412 = vector.shape_cast %409 : vector<8x128xf32> to vector<1x1x1x8x128xf32>
    tpu.vector_store %arg4[%c0_480, %c0_481, %c13_482, %c0_483, %c0_484], %412 {strides = array<i32>} : memref<1x4x16x8x128xf32, #tpu.memory_space<vmem>>, vector<1x1x1x8x128xf32>,
    %c0_485 = arith.constant 0 : index
    %c1_486 = arith.constant 1 : index
    %c13_487 = arith.constant 13 : index
    %c0_488 = arith.constant 0 : index
    %c0_489 = arith.constant 0 : index
    %413 = vector.load %arg4[%c0_485, %c1_486, %c13_487, %c0_488, %c0_489] : memref<1x4x16x8x128xf32, #tpu.memory_space<vmem>>, vector<1x1x1x8x128xf32>
    %414 = vector.shape_cast %413 : vector<1x1x1x8x128xf32> to vector<8x128xf32>
    %cst_490 = arith.constant 0.000000e+00 : f32
    %415 = vector.broadcast %cst_490 : f32 to vector<2x8x128xf32>
    %416 = arith.select %403, %17, %415 : vector<2x8x128xi1>, vector<2x8x128xf32>
    %cst_491 = arith.constant dense<0.000000e+00> : vector<8x128xf32>
    %417 = vector.multi_reduction <add>, %416, %cst_491 [0] : vector<2x8x128xf32> to vector<8x128xf32>
    %418 = arith.addf %414, %417 : vector<8x128xf32>
    %c0_492 = arith.constant 0 : index
    %c1_493 = arith.constant 1 : index
    %c13_494 = arith.constant 13 : index
    %c0_495 = arith.constant 0 : index
    %c0_496 = arith.constant 0 : index
    %419 = vector.load %arg4[%c0_492, %c1_493, %c13_494, %c0_495, %c0_496] : memref<1x4x16x8x128xf32, #tpu.memory_space<vmem>>, vector<1x1x1x8x128xf32>
    %420 = vector.shape_cast %419 : vector<1x1x1x8x128xf32> to vector<8x128xf32>
    %421 = vector.shape_cast %418 : vector<8x128xf32> to vector<1x1x1x8x128xf32>
    tpu.vector_store %arg4[%c0_492, %c1_493, %c13_494, %c0_495, %c0_496], %421 {strides = array<i32>} : memref<1x4x16x8x128xf32, #tpu.memory_space<vmem>>, vector<1x1x1x8x128xf32>,
    %c0_497 = arith.constant 0 : index
    %c2_498 = arith.constant 2 : index
    %c13_499 = arith.constant 13 : index
    %c0_500 = arith.constant 0 : index
    %c0_501 = arith.constant 0 : index
    %422 = vector.load %arg4[%c0_497, %c2_498, %c13_499, %c0_500, %c0_501] : memref<1x4x16x8x128xf32, #tpu.memory_space<vmem>>, vector<1x1x1x8x128xf32>
    %423 = vector.shape_cast %422 : vector<1x1x1x8x128xf32> to vector<8x128xf32>
    %424 = arith.extui %403 : vector<2x8x128xi1> to vector<2x8x128xi32>
    %425 = arith.sitofp %424 : vector<2x8x128xi32> to vector<2x8x128xf32>
    %cst_502 = arith.constant dense<0.000000e+00> : vector<8x128xf32>
    %426 = vector.multi_reduction <add>, %425, %cst_502 [0] : vector<2x8x128xf32> to vector<8x128xf32>
    %427 = arith.addf %423, %426 : vector<8x128xf32>
    %c0_503 = arith.constant 0 : index
    %c2_504 = arith.constant 2 : index
    %c13_505 = arith.constant 13 : index
    %c0_506 = arith.constant 0 : index
    %c0_507 = arith.constant 0 : index
    %428 = vector.load %arg4[%c0_503, %c2_504, %c13_505, %c0_506, %c0_507] : memref<1x4x16x8x128xf32, #tpu.memory_space<vmem>>, vector<1x1x1x8x128xf32>
    %429 = vector.shape_cast %428 : vector<1x1x1x8x128xf32> to vector<8x128xf32>
    %430 = vector.shape_cast %427 : vector<8x128xf32> to vector<1x1x1x8x128xf32>
    tpu.vector_store %arg4[%c0_503, %c2_504, %c13_505, %c0_506, %c0_507], %430 {strides = array<i32>} : memref<1x4x16x8x128xf32, #tpu.memory_space<vmem>>, vector<1x1x1x8x128xf32>,
    %cst_508 = arith.constant 0.933333337 : f32
    %431 = vector.broadcast %cst_508 : f32 to vector<2x8x128xf32>
    %432 = arith.cmpf oge, %16, %431 : vector<2x8x128xf32>
    %c0_509 = arith.constant 0 : index
    %c0_510 = arith.constant 0 : index
    %c14 = arith.constant 14 : index
    %c0_511 = arith.constant 0 : index
    %c0_512 = arith.constant 0 : index
    %433 = vector.load %arg4[%c0_509, %c0_510, %c14, %c0_511, %c0_512] : memref<1x4x16x8x128xf32, #tpu.memory_space<vmem>>, vector<1x1x1x8x128xf32>
    %434 = vector.shape_cast %433 : vector<1x1x1x8x128xf32> to vector<8x128xf32>
    %cst_513 = arith.constant 0.000000e+00 : f32
    %435 = vector.broadcast %cst_513 : f32 to vector<2x8x128xf32>
    %436 = arith.select %432, %16, %435 : vector<2x8x128xi1>, vector<2x8x128xf32>
    %cst_514 = arith.constant dense<0.000000e+00> : vector<8x128xf32>
    %437 = vector.multi_reduction <add>, %436, %cst_514 [0] : vector<2x8x128xf32> to vector<8x128xf32>
    %438 = arith.addf %434, %437 : vector<8x128xf32>
    %c0_515 = arith.constant 0 : index
    %c0_516 = arith.constant 0 : index
    %c14_517 = arith.constant 14 : index
    %c0_518 = arith.constant 0 : index
    %c0_519 = arith.constant 0 : index
    %439 = vector.load %arg4[%c0_515, %c0_516, %c14_517, %c0_518, %c0_519] : memref<1x4x16x8x128xf32, #tpu.memory_space<vmem>>, vector<1x1x1x8x128xf32>
    %440 = vector.shape_cast %439 : vector<1x1x1x8x128xf32> to vector<8x128xf32>
    %441 = vector.shape_cast %438 : vector<8x128xf32> to vector<1x1x1x8x128xf32>
    tpu.vector_store %arg4[%c0_515, %c0_516, %c14_517, %c0_518, %c0_519], %441 {strides = array<i32>} : memref<1x4x16x8x128xf32, #tpu.memory_space<vmem>>, vector<1x1x1x8x128xf32>,
    %c0_520 = arith.constant 0 : index
    %c1_521 = arith.constant 1 : index
    %c14_522 = arith.constant 14 : index
    %c0_523 = arith.constant 0 : index
    %c0_524 = arith.constant 0 : index
    %442 = vector.load %arg4[%c0_520, %c1_521, %c14_522, %c0_523, %c0_524] : memref<1x4x16x8x128xf32, #tpu.memory_space<vmem>>, vector<1x1x1x8x128xf32>
    %443 = vector.shape_cast %442 : vector<1x1x1x8x128xf32> to vector<8x128xf32>
    %cst_525 = arith.constant 0.000000e+00 : f32
    %444 = vector.broadcast %cst_525 : f32 to vector<2x8x128xf32>
    %445 = arith.select %432, %17, %444 : vector<2x8x128xi1>, vector<2x8x128xf32>
    %cst_526 = arith.constant dense<0.000000e+00> : vector<8x128xf32>
    %446 = vector.multi_reduction <add>, %445, %cst_526 [0] : vector<2x8x128xf32> to vector<8x128xf32>
    %447 = arith.addf %443, %446 : vector<8x128xf32>
    %c0_527 = arith.constant 0 : index
    %c1_528 = arith.constant 1 : index
    %c14_529 = arith.constant 14 : index
    %c0_530 = arith.constant 0 : index
    %c0_531 = arith.constant 0 : index
    %448 = vector.load %arg4[%c0_527, %c1_528, %c14_529, %c0_530, %c0_531] : memref<1x4x16x8x128xf32, #tpu.memory_space<vmem>>, vector<1x1x1x8x128xf32>
    %449 = vector.shape_cast %448 : vector<1x1x1x8x128xf32> to vector<8x128xf32>
    %450 = vector.shape_cast %447 : vector<8x128xf32> to vector<1x1x1x8x128xf32>
    tpu.vector_store %arg4[%c0_527, %c1_528, %c14_529, %c0_530, %c0_531], %450 {strides = array<i32>} : memref<1x4x16x8x128xf32, #tpu.memory_space<vmem>>, vector<1x1x1x8x128xf32>,
    %c0_532 = arith.constant 0 : index
    %c2_533 = arith.constant 2 : index
    %c14_534 = arith.constant 14 : index
    %c0_535 = arith.constant 0 : index
    %c0_536 = arith.constant 0 : index
    %451 = vector.load %arg4[%c0_532, %c2_533, %c14_534, %c0_535, %c0_536] : memref<1x4x16x8x128xf32, #tpu.memory_space<vmem>>, vector<1x1x1x8x128xf32>
    %452 = vector.shape_cast %451 : vector<1x1x1x8x128xf32> to vector<8x128xf32>
    %453 = arith.extui %432 : vector<2x8x128xi1> to vector<2x8x128xi32>
    %454 = arith.sitofp %453 : vector<2x8x128xi32> to vector<2x8x128xf32>
    %cst_537 = arith.constant dense<0.000000e+00> : vector<8x128xf32>
    %455 = vector.multi_reduction <add>, %454, %cst_537 [0] : vector<2x8x128xf32> to vector<8x128xf32>
    %456 = arith.addf %452, %455 : vector<8x128xf32>
    %c0_538 = arith.constant 0 : index
    %c2_539 = arith.constant 2 : index
    %c14_540 = arith.constant 14 : index
    %c0_541 = arith.constant 0 : index
    %c0_542 = arith.constant 0 : index
    %457 = vector.load %arg4[%c0_538, %c2_539, %c14_540, %c0_541, %c0_542] : memref<1x4x16x8x128xf32, #tpu.memory_space<vmem>>, vector<1x1x1x8x128xf32>
    %458 = vector.shape_cast %457 : vector<1x1x1x8x128xf32> to vector<8x128xf32>
    %459 = vector.shape_cast %456 : vector<8x128xf32> to vector<1x1x1x8x128xf32>
    tpu.vector_store %arg4[%c0_538, %c2_539, %c14_540, %c0_541, %c0_542], %459 {strides = array<i32>} : memref<1x4x16x8x128xf32, #tpu.memory_space<vmem>>, vector<1x1x1x8x128xf32>,
    %cst_543 = arith.constant 1.010000e+00 : f32
    %460 = vector.broadcast %cst_543 : f32 to vector<2x8x128xf32>
    %461 = arith.cmpf oge, %16, %460 : vector<2x8x128xf32>
    %c0_544 = arith.constant 0 : index
    %c0_545 = arith.constant 0 : index
    %c15 = arith.constant 15 : index
    %c0_546 = arith.constant 0 : index
    %c0_547 = arith.constant 0 : index
    %462 = vector.load %arg4[%c0_544, %c0_545, %c15, %c0_546, %c0_547] : memref<1x4x16x8x128xf32, #tpu.memory_space<vmem>>, vector<1x1x1x8x128xf32>
    %463 = vector.shape_cast %462 : vector<1x1x1x8x128xf32> to vector<8x128xf32>
    %cst_548 = arith.constant 0.000000e+00 : f32
    %464 = vector.broadcast %cst_548 : f32 to vector<2x8x128xf32>
    %465 = arith.select %461, %16, %464 : vector<2x8x128xi1>, vector<2x8x128xf32>
    %cst_549 = arith.constant dense<0.000000e+00> : vector<8x128xf32>
    %466 = vector.multi_reduction <add>, %465, %cst_549 [0] : vector<2x8x128xf32> to vector<8x128xf32>
    %467 = arith.addf %463, %466 : vector<8x128xf32>
    %c0_550 = arith.constant 0 : index
    %c0_551 = arith.constant 0 : index
    %c15_552 = arith.constant 15 : index
    %c0_553 = arith.constant 0 : index
    %c0_554 = arith.constant 0 : index
    %468 = vector.load %arg4[%c0_550, %c0_551, %c15_552, %c0_553, %c0_554] : memref<1x4x16x8x128xf32, #tpu.memory_space<vmem>>, vector<1x1x1x8x128xf32>
    %469 = vector.shape_cast %468 : vector<1x1x1x8x128xf32> to vector<8x128xf32>
    %470 = vector.shape_cast %467 : vector<8x128xf32> to vector<1x1x1x8x128xf32>
    tpu.vector_store %arg4[%c0_550, %c0_551, %c15_552, %c0_553, %c0_554], %470 {strides = array<i32>} : memref<1x4x16x8x128xf32, #tpu.memory_space<vmem>>, vector<1x1x1x8x128xf32>,
    %c0_555 = arith.constant 0 : index
    %c1_556 = arith.constant 1 : index
    %c15_557 = arith.constant 15 : index
    %c0_558 = arith.constant 0 : index
    %c0_559 = arith.constant 0 : index
    %471 = vector.load %arg4[%c0_555, %c1_556, %c15_557, %c0_558, %c0_559] : memref<1x4x16x8x128xf32, #tpu.memory_space<vmem>>, vector<1x1x1x8x128xf32>
    %472 = vector.shape_cast %471 : vector<1x1x1x8x128xf32> to vector<8x128xf32>
    %cst_560 = arith.constant 0.000000e+00 : f32
    %473 = vector.broadcast %cst_560 : f32 to vector<2x8x128xf32>
    %474 = arith.select %461, %17, %473 : vector<2x8x128xi1>, vector<2x8x128xf32>
    %cst_561 = arith.constant dense<0.000000e+00> : vector<8x128xf32>
    %475 = vector.multi_reduction <add>, %474, %cst_561 [0] : vector<2x8x128xf32> to vector<8x128xf32>
    %476 = arith.addf %472, %475 : vector<8x128xf32>
    %c0_562 = arith.constant 0 : index
    %c1_563 = arith.constant 1 : index
    %c15_564 = arith.constant 15 : index
    %c0_565 = arith.constant 0 : index
    %c0_566 = arith.constant 0 : index
    %477 = vector.load %arg4[%c0_562, %c1_563, %c15_564, %c0_565, %c0_566] : memref<1x4x16x8x128xf32, #tpu.memory_space<vmem>>, vector<1x1x1x8x128xf32>
    %478 = vector.shape_cast %477 : vector<1x1x1x8x128xf32> to vector<8x128xf32>
    %479 = vector.shape_cast %476 : vector<8x128xf32> to vector<1x1x1x8x128xf32>
    tpu.vector_store %arg4[%c0_562, %c1_563, %c15_564, %c0_565, %c0_566], %479 {strides = array<i32>} : memref<1x4x16x8x128xf32, #tpu.memory_space<vmem>>, vector<1x1x1x8x128xf32>,
    %c0_567 = arith.constant 0 : index
    %c2_568 = arith.constant 2 : index
    %c15_569 = arith.constant 15 : index
    %c0_570 = arith.constant 0 : index
    %c0_571 = arith.constant 0 : index
    %480 = vector.load %arg4[%c0_567, %c2_568, %c15_569, %c0_570, %c0_571] : memref<1x4x16x8x128xf32, #tpu.memory_space<vmem>>, vector<1x1x1x8x128xf32>
    %481 = vector.shape_cast %480 : vector<1x1x1x8x128xf32> to vector<8x128xf32>
    %482 = arith.extui %461 : vector<2x8x128xi1> to vector<2x8x128xi32>
    %483 = arith.sitofp %482 : vector<2x8x128xi32> to vector<2x8x128xf32>
    %cst_572 = arith.constant dense<0.000000e+00> : vector<8x128xf32>
    %484 = vector.multi_reduction <add>, %483, %cst_572 [0] : vector<2x8x128xf32> to vector<8x128xf32>
    %485 = arith.addf %481, %484 : vector<8x128xf32>
    %c0_573 = arith.constant 0 : index
    %c2_574 = arith.constant 2 : index
    %c15_575 = arith.constant 15 : index
    %c0_576 = arith.constant 0 : index
    %c0_577 = arith.constant 0 : index
    %486 = vector.load %arg4[%c0_573, %c2_574, %c15_575, %c0_576, %c0_577] : memref<1x4x16x8x128xf32, #tpu.memory_space<vmem>>, vector<1x1x1x8x128xf32>
    %487 = vector.shape_cast %486 : vector<1x1x1x8x128xf32> to vector<8x128xf32>
    %488 = vector.shape_cast %485 : vector<8x128xf32> to vector<1x1x1x8x128xf32>
    tpu.vector_store %arg4[%c0_573, %c2_574, %c15_575, %c0_576, %c0_577], %488 {strides = array<i32>} : memref<1x4x16x8x128xf32, #tpu.memory_space<vmem>>, vector<1x1x1x8x128xf32>,
    return
  }
  func.func @transform_0(%arg0: i32, %arg1: i32) -> (i32, i32) {
    %c1_i32 = arith.constant 1 : i32
    %0 = arith.muli %arg0, %c1_i32 : i32
    %1 = arith.addi %0, %arg1 : i32
    %c0_i32 = arith.constant 0 : i32
    %2 = arith.minsi %1, %c0_i32 : i32
    %c0_i32_0 = arith.constant 0 : i32
    %c0_i32_1 = arith.constant 0 : i32
    return %2, %c0_i32_0 : i32, i32
  }
  func.func @transform_1(%arg0: i32, %arg1: i32) -> (i32, i32) {
    %c1_i32 = arith.constant 1 : i32
    %0 = arith.muli %arg0, %c1_i32 : i32
    %1 = arith.addi %0, %arg1 : i32
    %c0_i32 = arith.constant 0 : i32
    %2 = arith.minsi %1, %c0_i32 : i32
    %c0_i32_0 = arith.constant 0 : i32
    %c0_i32_1 = arith.constant 0 : i32
    return %2, %c0_i32_0 : i32, i32
  }
  func.func @transform_2(%arg0: i32, %arg1: i32) -> (i32, i32, i32, i32, i32) {
    %c0_i32 = arith.constant 0 : i32
    %c0_i32_0 = arith.constant 0 : i32
    %c0_i32_1 = arith.constant 0 : i32
    %c0_i32_2 = arith.constant 0 : i32
    %c0_i32_3 = arith.constant 0 : i32
    return %arg0, %c0_i32, %c0_i32_0, %c0_i32_1, %c0_i32_2 : i32, i32, i32, i32, i32
  }
}

</mosaic_0001>

<bundles_post_ra>
// kernel: tpu_custom_call.1
= control target key start
LH: loop header
LB: loop body
LE: loop exit
PB: predicated region body
PF: predicated region fallthrough
CT: control target
= control target key end

     0   :  { %7 = vsyncpa [#allocation3], 0  ;;  %s1690_s0 = inlined_call_operand.hbm [shape: f32[16,128], index: 0, kind: input, shape index: {}]   ;;  %s1691_s1 = inlined_call_operand.hbm [shape: f32[16,128], index: 1, kind: input, shape index: {}]   ;;  %s1692_s2 = inlined_call_operand.hbm [shape: f32[2,4,16,8,128], index: 2, kind: output, shape index: {}]  }
   0x1   :  { %9 = vsyncpa [#allocation3 + $0x1], 0 }
   0x2   :  { %10 = vsyncpa [#allocation6], 0 }
   0x3   :  { %12 = vsyncpa [#allocation6 + $0x1], 0 }
   0x4   :  { %13 = vsyncpa [#allocation4], 0 }
   0x5   :  { %15 = vsyncpa [#allocation4 + $0x1], 0  ;;  %s1291_s9 = smov 0   ;;  %s1293_s10 = smov 0  }
   0x6   :  { %s1295_s11 = smov 0   ;;  %s1297_s12 = smov 0  }
   0x7   :  { %s1299_s13 = smov 0   ;;  %s1301_s14 = smov 0  }
   0x8   :  { %s1303_s15 = smov 0   ;;  %s1305_s16 = smov 0  }
   0x9 LB: > { %s853_s17 = sadd.s32 4294967295, %s1267_s16   ;;  %s854_s18 = sadd.s32 4294967294, %s1267_s16   ;;  %s1267_s16 = sphi %s1305_s16, %s21_s16   ;;  %s1263_s15 = sphi %s1303_s15, %s1704_s15   ;;  %s1259_s14 = sphi %s1301_s14, %s1703_s14   ;;  %s1255_s13 = sphi %s1299_s13, %s1680_s13   ;;  %s1251_s12 = sphi %s1297_s12, %s1702_s12   ;;  %s1247_s11 = sphi %s1295_s11, %s1701_s11   ;;  %s1243_s10 = sphi %s1293_s10, %s1700_s10   ;;  %s1239_s9 = sphi %s1291_s9, %s1699_s9  }
   0xa   : > { %s33_s19 = sadd.s32 1, %s1263_s15  ;;  %p1236_p1 = scmp.ne.s32.totalorder %s1255_s13, 0 }
   0xb   : > { %p35_p0 = scmp.ge.s32.totalorder %s33_s19, 2  ;;  %p54_p2 = scmp.eq.s32.totalorder %s1267_s16, 0 }
   0xc   : > { %p59_p3 = scmp.ne.s32.totalorder %s1255_s13, %s1251_s12  ;;  %p60_p5 = scmp.eq.s32.totalorder %s853_s17, 0 }
   0xd   : > { %s1706_s19 = smov (%p35_p0, %s33_s19), 0  ;;  %p1337_p4 = por %p1236_p1, %p54_p2 }
   0xe   : > { %p1341_p6 = por %p60_p5, %p59_p3  ;;  %s101_s22 = ssub.s32 %s1263_s15, %s1706_s19 }
   0xf   : > { %p102_p7 = scmp.eq.s32.totalorder %s101_s22, 0  ;;  %s104_s23 = sadd.s32 1, %s1247_s11 }
  0x10   : > { %p114_p8 = scmp.ne.s32.totalorder %s1247_s11, %s1243_s10  ;;  %p115_p9 = scmp.eq.s32.totalorder %s853_s17, 1 }
  0x11   : > { %s1349_s24 = scalar_select %p102_p7, %s1247_s11, %s104_s23  }
  0x12   : > { %p120_p10 = scmp.ne.s32.totalorder %s1243_s10, %s1239_s9  ;;  %p121_p11 = scmp.eq.s32.totalorder %s854_s18, 1 }
  0x13   : > { %p1355_p12 = por %p115_p9, %p114_p8  ;;  %p856_p13 = scmp.ge.s32.totalorder %s1267_s16, 2 }
  0x14   : > { %p1360_p0 = por %p121_p11, %p120_p10  ;;  %p1021_p1 = scmp.lt.s32.totalorder %s1267_s16, 2 }
  0x15   : > { %s154_s29 = sshll.u32 %s1690_s0, 4  ;;  %s1269_s30 = smov [#allocation2]   ;;  %s155_s29 = int_to_ptr.hbm [resolvable:$true] %s154_s29 }
  0x16   : > { %s156_s3 = sshll.u32 %s1269_s30, 4  ;;  %p1370_p2 = pnand %p1021_p1, %p1337_p4  ;;  %s157_s3 = int_to_ptr.vmem [resolvable:$true] %s156_s3 }
  0x17   : > { %p863_p3 = scmp.ge.s32.totalorder %s1267_s16, 1  ;;  %p189_p5 = scmp.lt.s32.totalorder %s1267_s16, 3 }
  0x18   : > { %s1100_s5 = sshra.s32 %s155_s29, 4  ;;  %p1104_p8 = pneg %p1370_p2  ;;  %s1101_s5 = int_to_ptr.hbm [resolvable:$true] %s1100_s5 }
  0x19   : > { %s1102_s6 = scalar_lea.hbm %s1101_s5, 16  ;;  %s1107_s12 = scalar_lea.hbm %s1690_s0, 16 }
  0x1a   : > { %p1103_p7 = scmp.ne.s32.totalorder %s1101_s5, %s1102_s6  ;;  %p1109_p4 = scmp.lt.s32.totalorder %s1107_s12, %s1102_s6 }
  0x1c   : > { %p1105_p9 = pnand %p1104_p8, %p1103_p7 }
  0x1e   : > { %p1106_p10 = pneg %p1105_p9 }
  0x20   : > { %p1111_p11 = pnand %p1109_p4, %p1106_p10 }
  0x22   : > { %1114 = shalt.err (!%p1111_p11)
}
  0x23   : > { %s1270_s17 = smov 128   ;;  %s1271_s18 = smov 8  }
  0x24   : > { %1013 = dma.hbm_to_vmem [thread:$0]  (!%p1370_p2), %s155_s29, 256, %s157_s3, [#allocation3], %s1270_s17, %s1270_s17, %s1271_s18  }
  0x25   : > { %p1390_p1 = pnand %p863_p3, %p189_p5  ;;  %s179_s27 = sshll.u32 %s1691_s1, 4  ;;  %s180_s27 = int_to_ptr.hbm [resolvable:$true] %s179_s27 }
  0x26   : > { %s1272_s28 = smov [#allocation5]   ;;  %s1130_s5 = sshra.s32 %s180_s27, 4  ;;  %s1131_s5 = int_to_ptr.hbm [resolvable:$true] %s1130_s5 }
  0x27   : > { %s181_s30 = sshll.u32 %s1272_s28, 4  ;;  %s1132_s6 = scalar_lea.hbm %s1131_s5, 16  ;;  %s182_s30 = int_to_ptr.vmem [resolvable:$true] %s181_s30 }
  0x28   : > { %p1133_p7 = scmp.ne.s32.totalorder %s1131_s5, %s1132_s6  ;;  %s1137_s7 = scalar_lea.hbm %s1691_s1, 16 }
  0x29   : > { %p1139_p3 = scmp.lt.s32.totalorder %s1137_s7, %s1132_s6 }
  0x2a   : > { %p1135_p9 = pnand %p1133_p7, %p1104_p8 }
  0x2c   : > { %p1136_p10 = pneg %p1135_p9 }
  0x2e   : > { %p1141_p5 = pnand %p1139_p3, %p1136_p10 }
  0x30   : > { %1144 = shalt.err (!%p1141_p5)
}
  0x31   : > { %1016 = dma.hbm_to_vmem [thread:$0]  (!%p1370_p2), %s180_s27, 256, %s182_s30, [#allocation6], %s1270_s17, %s1270_s17, %s1271_s18  }
  0x32   : > { %193 = sbr.rel (%p1390_p1) target bundleno = 128 (0x80), region = 28  ;;  %s195_s8 = sand.u32 (!%p1390_p1), 1, %s1255_s13  }
  0x33   : > { %s864_s12 = sshll.u32 (!%p1390_p1), %s195_s8, 4  ;;  %s196_s22 = scalar_lea.sflag (!%p1390_p1), [#allocation3], %s195_s8 }
  0x34   : > { %s199_s23 = scalar_lea.vmem (!%p1390_p1), [#allocation2], %s864_s12 }
  0x37   : > { %1225 = dma.done.wait (%p1341_p6), %s196_s22, 256  }
  0x38   : > { %1227 = vsyncadd (%p1341_p6), %s196_s22, 4294967040  ;;  %s206_s28 = scalar_lea.sflag [#allocation6], %s195_s8  ;;  %s209_s5 = scalar_lea.vmem [#allocation5], %s864_s12 }
  0x39   : > { %1229 = dma.done.wait (%p1341_p6), %s206_s28, 256  }
  0x3a   : > { %1231 = vsyncadd (%p1341_p6), %s206_s28, 4294967040  ;;  %s233_s4 = sand.u32 1, %s1243_s10   ;;  %s867_s17 = sshll.u32 %s1259_s14, 4  ;;  %v315_v0 = vlaneseq  ;;  %v1273_v3 = vmov 0.0   ;;  %v321_v5 = vld [vmem:[%s199_s23] sm:$0xff]  ;;  %v322_v6 = vld [vmem:[%s199_s23 + $0x8] sm:$0xff] }
  0x3b   : > { %s866_s18 = sshll.u32 %s233_s4, 9  ;;  %s314_s20 = ssub.s32 16, %s867_s17  ;;  %v325_v7 = vld [vmem:[%s209_s5] sm:$0xff]  ;;  %v326_v10 = vld [vmem:[%s209_s5 + $0x8] sm:$0xff] }
  0x3c   : > { %v316_v1 = vshrl.u32 %v315_v0, 7  ;;  %v318_v2 = vstv %s314_s20  ;;  %s1420_s27 = scalar_lea.vmem [#allocation7], %s866_s18  ;;  %s1003_s21 = sshll.u32 %s1259_s14, 9 }
  0x3d   : > { %297 = vst [vmem:[%s1420_s27 + $0x188] sm:$0xff] %v1273_v3  ;;  %s745_s6 = scalar_lea.hbm %s1692_s2, %s1003_s21  ;;  %s746_s29 = sshll.u32 %s1420_s27, 4  ;;  %s747_s29 = int_to_ptr.vmem [resolvable:$true] %s746_s29 }
  0x3e   : > { %298 = vst [vmem:[%s1420_s27 + $0x190] sm:$0xff] %v1273_v3  ;;  %v317_v4 = vadd.s32 8, %v316_v1  ;;  %vm319_vm0 = vcmp.lt.s32.totalorder %v316_v1, %v318_v2  ;;  %s748_s3 = sshll.u32 %s745_s6, 4  ;;  %s734_s7 = scalar_lea.sflag [#allocation4], %s233_s4  ;;  %s749_s3 = int_to_ptr.hbm [resolvable:$true] %s748_s3 }
  0x3f   : > { %299 = vst [vmem:[%s1420_s27 + $0x198] sm:$0xff] %v1273_v3  ;;  %v1434_v8 = vsel %vm319_vm0, %v321_v5, -1.0  ;;  %v1438_v11 = vsel %vm319_vm0, %v325_v7, 0.0  ;;  %s1174_s8 = sshra.s32 %s749_s3, 4  ;;  %s1180_s28 = scalar_lea.hbm %s1692_s2, 1024  ;;  %s1175_s8 = int_to_ptr.hbm [resolvable:$true] %s1174_s8 }
  0x40   : > { %300 = vst [vmem:[%s1420_s27 + $0x1a0] sm:$0xff] %v1273_v3  ;;  %vm320_vm1 = vcmp.lt.s32.totalorder %v317_v4, %v318_v2  ;;  %vm334_vm2 = vcmp.ge.f32.partialorder %v1434_v8, 0.0  ;;  %vm358_vm4 = vcmp.ge.f32.partialorder %v1434_v8, 0.06666667  ;;  %vm383_vm6 = vcmp.ge.f32.partialorder %v1434_v8, 0.13333334  ;;  %p1181_p4 = scmp.lt.s32.totalorder %s1175_s8, %s1692_s2 }
  0x41   : > { %301 = vst [vmem:[%s1420_s27 + $0x1a8] sm:$0xff] %v1273_v3  ;;  %v1436_v9 = vsel %vm320_vm1, %v322_v6, -1.0  ;;  %v1442_v12 = vsel %vm320_vm1, %v326_v10, 0.0  ;;  %v337_v14 = vsel %vm334_vm2, %v1434_v8, 0.0  ;;  %v344_v16 = vsel %vm334_vm2, %v1438_v11, 0.0  ;;  %s1176_s12 = scalar_lea.hbm %s1175_s8, 512 }
  0x42   : > { %302 = vst [vmem:[%s1420_s27 + $0x1b0] sm:$0xff] %v1273_v3  ;;  %vm335_vm3 = vcmp.ge.f32.partialorder %v1436_v9, 0.0  ;;  %v331_v13 = vadd.f32 %v1442_v12, %v1438_v11  ;;  %v873_v19 = vsel %vm334_vm2, 1.0, %v1273_v3  ;;  %vm359_vm5 = vcmp.ge.f32.partialorder %v1436_v9, 0.06666667  ;;  %p1177_p6 = scmp.ne.s32.totalorder %s1175_s8, %s1176_s12  ;;  %p1182_p11 = scmp.lt.s32.totalorder %s1180_s28, %s1176_s12 }
  0x43   : > { %303 = vst [vmem:[%s1420_s27 + $0x1b8] sm:$0xff] %v1273_v3  ;;  %v338_v15 = vsel %vm335_vm3, %v1436_v9, 0.0  ;;  %v345_v18 = vsel %vm335_vm3, %v1442_v12, 0.0  ;;  %v874_v20 = vsel %vm335_vm3, 1.0, %v1273_v3  ;;  %v362_v23 = vsel %vm358_vm4, %v1434_v8, 0.0 }
  0x44   : > { %304 = vst [vmem:[%s1420_s27 + $0x1c0] sm:$0xff] %v1273_v3  ;;  %v339_v17 = vadd.f32 %v338_v15, %v337_v14  ;;  %v346_v21 = vadd.f32 %v345_v18, %v344_v16  ;;  %v355_v22 = vadd.f32 %v874_v20, %v873_v19  ;;  %v363_v24 = vsel %vm359_vm5, %v1436_v9, 0.0  ;;  %p1178_p2 = pnand %p1177_p6, %p1355_p12  ;;  %p1183_p1 = por %p1182_p11, %p1181_p4 }
  0x45   : > { %305 = vst [vmem:[%s1420_s27 + $0x1c8] sm:$0xff] %v1273_v3  ;;  %v369_v25 = vsel %vm358_vm4, %v1438_v11, 0.0  ;;  %v364_v26 = vadd.f32 %v363_v24, %v362_v23  ;;  %v370_v27 = vsel %vm359_vm5, %v1442_v12, 0.0  ;;  %v881_v29 = vsel %vm358_vm4, 1.0, %v1273_v3 }
  0x46   : > { %306 = vst [vmem:[%s1420_s27 + $0x1d0] sm:$0xff] %v1273_v3  ;;  %v371_v28 = vadd.f32 %v370_v27, %v369_v25  ;;  %v882_v30 = vsel %vm359_vm5, 1.0, %v1273_v3  ;;  %vm384_vm7 = vcmp.ge.f32.partialorder %v1436_v9, 0.13333334  ;;  %v387_v32 = vsel %vm383_vm6, %v1434_v8, 0.0  ;;  %p1179_p8 = pneg %p1178_p2 }
  0x47   : > { %307 = vst [vmem:[%s1420_s27 + $0x1d8] sm:$0xff] %v1273_v3  ;;  %v380_v31 = vadd.f32 %v882_v30, %v881_v29  ;;  %v388_v33 = vsel %vm384_vm7, %v1436_v9, 0.0  ;;  %v394_v34 = vsel %vm383_vm6, %v1438_v11, 0.0  ;;  %v395_v35 = vsel %vm384_vm7, %v1442_v12, 0.0 }
  0x48   : > { %308 = vst [vmem:[%s1420_s27 + $0x1e0] sm:$0xff] %v1273_v3  ;;  %v389_v36 = vadd.f32 %v388_v33, %v387_v32  ;;  %v396_v37 = vadd.f32 %v395_v35, %v394_v34  ;;  %v889_v38 = vsel %vm383_vm6, 1.0, %v1273_v3  ;;  %v890_v39 = vsel %vm384_vm7, 1.0, %v1273_v3  ;;  %p1184_p7 = pnand %p1183_p1, %p1179_p8 }
  0x49   : > { %309 = vst [vmem:[%s1420_s27 + $0x1e8] sm:$0xff] %v1273_v3  ;;  %vm408_vm8 = vcmp.ge.f32.partialorder %v1434_v8, 0.2  ;;  %vm409_vm9 = vcmp.ge.f32.partialorder %v1436_v9, 0.2  ;;  %v405_v40 = vadd.f32 %v890_v39, %v889_v38 }
  0x4a   : > { %310 = vst [vmem:[%s1420_s27 + $0x1f0] sm:$0xff] %v1273_v3  ;;  %v412_v41 = vsel %vm408_vm8, %v1434_v8, 0.0  ;;  %v413_v42 = vsel %vm409_vm9, %v1436_v9, 0.0  ;;  %v419_v43 = vsel %vm408_vm8, %v1438_v11, 0.0  ;;  %v420_v44 = vsel %vm409_vm9, %v1442_v12, 0.0 }
  0x4b   : > { %311 = vst [vmem:[%s1420_s27 + $0x1f8] sm:$0xff] %v1273_v3  ;;  %v897_v45 = vsel %vm408_vm8, 1.0, %v1273_v3  ;;  %v414_v46 = vadd.f32 %v413_v42, %v412_v41  ;;  %v421_v47 = vadd.f32 %v420_v44, %v419_v43  ;;  %v898_v48 = vsel %vm409_vm9, 1.0, %v1273_v3 }
  0x4c   : > { %869 = vst [vmem:[%s1420_s27 + $0x180] sm:$0xff] %v331_v13  ;;  %v430_v49 = vadd.f32 %v898_v48, %v897_v45  ;;  %vm433_vm10 = vcmp.ge.f32.partialorder %v1434_v8, 0.26666668  ;;  %vm434_vm11 = vcmp.ge.f32.partialorder %v1436_v9, 0.26666668 }
  0x4d   : > { %341 = vst [vmem:[%s1420_s27] sm:$0xff] %v339_v17  ;;  %v437_v50 = vsel %vm433_vm10, %v1434_v8, 0.0  ;;  %v438_v51 = vsel %vm434_vm11, %v1436_v9, 0.0  ;;  %v444_v53 = vsel %vm433_vm10, %v1438_v11, 0.0  ;;  %v445_v54 = vsel %vm434_vm11, %v1442_v12, 0.0 }
  0x4e   : > { %871 = vst [vmem:[%s1420_s27 + $0x80] sm:$0xff] %v346_v21  ;;  %v439_v52 = vadd.f32 %v438_v51, %v437_v50  ;;  %v446_v55 = vadd.f32 %v445_v54, %v444_v53  ;;  %v905_v56 = vsel %vm433_vm10, 1.0, %v1273_v3  ;;  %v906_v57 = vsel %vm434_vm11, 1.0, %v1273_v3 }
  0x4f   : > { %875 = vst [vmem:[%s1420_s27 + $0x100] sm:$0xff] %v355_v22  ;;  %vm458_vm12 = vcmp.ge.f32.partialorder %v1434_v8, 0.33333334  ;;  %v455_v58 = vadd.f32 %v906_v57, %v905_v56  ;;  %vm459_vm13 = vcmp.ge.f32.partialorder %v1436_v9, 0.33333334 }
  0x50   : > { %877 = vst [vmem:[%s1420_s27 + $0x8] sm:$0xff] %v364_v26  ;;  %v462_v59 = vsel %vm458_vm12, %v1434_v8, 0.0  ;;  %v463_v60 = vsel %vm459_vm13, %v1436_v9, 0.0  ;;  %v469_v61 = vsel %vm458_vm12, %v1438_v11, 0.0  ;;  %v470_v62 = vsel %vm459_vm13, %v1442_v12, 0.0 }
  0x51   : > { %879 = vst [vmem:[%s1420_s27 + $0x88] sm:$0xff] %v371_v28  ;;  %v464_v63 = vadd.f32 %v463_v60, %v462_v59  ;;  %v471_v0 = vadd.f32 %v470_v62, %v469_v61  ;;  %v913_v1 = vsel %vm458_vm12, 1.0, %v1273_v3  ;;  %v914_v2 = vsel %vm459_vm13, 1.0, %v1273_v3 }
  0x52   : > { %883 = vst [vmem:[%s1420_s27 + $0x108] sm:$0xff] %v380_v31  ;;  %vm483_vm14 = vcmp.ge.f32.partialorder %v1434_v8, 0.4  ;;  %vm484_vm15 = vcmp.ge.f32.partialorder %v1436_v9, 0.4  ;;  %v480_v4 = vadd.f32 %v914_v2, %v913_v1 }
  0x53   : > { %885 = vst [vmem:[%s1420_s27 + $0x10] sm:$0xff] %v389_v36  ;;  %v487_v5 = vsel %vm483_vm14, %v1434_v8, 0.0  ;;  %v488_v6 = vsel %vm484_vm15, %v1436_v9, 0.0  ;;  %v494_v7 = vsel %vm483_vm14, %v1438_v11, 0.0  ;;  %v495_v10 = vsel %vm484_vm15, %v1442_v12, 0.0 }
  0x54   : > { %887 = vst [vmem:[%s1420_s27 + $0x90] sm:$0xff] %v396_v37  ;;  %v921_v13 = vsel %vm483_vm14, 1.0, %v1273_v3  ;;  %v489_v14 = vadd.f32 %v488_v6, %v487_v5  ;;  %v496_v15 = vadd.f32 %v495_v10, %v494_v7  ;;  %v922_v16 = vsel %vm484_vm15, 1.0, %v1273_v3 }
  0x55   : > { %891 = vst [vmem:[%s1420_s27 + $0x110] sm:$0xff] %v405_v40  ;;  %v505_v17 = vadd.f32 %v922_v16, %v921_v13  ;;  %vm508_vm0 = vcmp.ge.f32.partialorder %v1434_v8, 0.46666667  ;;  %vm509_vm1 = vcmp.ge.f32.partialorder %v1436_v9, 0.46666667 }
  0x56   : > { %893 = vst [vmem:[%s1420_s27 + $0x18] sm:$0xff] %v414_v46  ;;  %v512_v18 = vsel %vm508_vm0, %v1434_v8, 0.0  ;;  %v513_v19 = vsel %vm509_vm1, %v1436_v9, 0.0  ;;  %v519_v21 = vsel %vm508_vm0, %v1438_v11, 0.0  ;;  %v520_v22 = vsel %vm509_vm1, %v1442_v12, 0.0 }
  0x57   : > { %895 = vst [vmem:[%s1420_s27 + $0x98] sm:$0xff] %v421_v47  ;;  %v514_v20 = vadd.f32 %v513_v19, %v512_v18  ;;  %v521_v23 = vadd.f32 %v520_v22, %v519_v21  ;;  %v929_v24 = vsel %vm508_vm0, 1.0, %v1273_v3  ;;  %v930_v25 = vsel %vm509_vm1, 1.0, %v1273_v3 }
  0x58   : > { %899 = vst [vmem:[%s1420_s27 + $0x118] sm:$0xff] %v430_v49  ;;  %vm533_vm2 = vcmp.ge.f32.partialorder %v1434_v8, 0.53333336  ;;  %v530_v26 = vadd.f32 %v930_v25, %v929_v24  ;;  %vm534_vm3 = vcmp.ge.f32.partialorder %v1436_v9, 0.53333336 }
  0x59   : > { %901 = vst [vmem:[%s1420_s27 + $0x20] sm:$0xff] %v439_v52  ;;  %v537_v27 = vsel %vm533_vm2, %v1434_v8, 0.0  ;;  %v538_v28 = vsel %vm534_vm3, %v1436_v9, 0.0  ;;  %v544_v29 = vsel %vm533_vm2, %v1438_v11, 0.0  ;;  %v545_v30 = vsel %vm534_vm3, %v1442_v12, 0.0 }
  0x5a   : > { %903 = vst [vmem:[%s1420_s27 + $0xa0] sm:$0xff] %v446_v55  ;;  %v539_v31 = vadd.f32 %v538_v28, %v537_v27  ;;  %v546_v32 = vadd.f32 %v545_v30, %v544_v29  ;;  %v937_v33 = vsel %vm533_vm2, 1.0, %v1273_v3  ;;  %v938_v34 = vsel %vm534_vm3, 1.0, %v1273_v3 }
  0x5b   : > { %907 = vst [vmem:[%s1420_s27 + $0x120] sm:$0xff] %v455_v58  ;;  %vm558_vm4 = vcmp.ge.f32.partialorder %v1434_v8, 0.6  ;;  %vm559_vm5 = vcmp.ge.f32.partialorder %v1436_v9, 0.6  ;;  %v555_v35 = vadd.f32 %v938_v34, %v937_v33 }
  0x5c   : > { %909 = vst [vmem:[%s1420_s27 + $0x28] sm:$0xff] %v464_v63  ;;  %v562_v36 = vsel %vm558_vm4, %v1434_v8, 0.0  ;;  %v563_v37 = vsel %vm559_vm5, %v1436_v9, 0.0  ;;  %v569_v38 = vsel %vm558_vm4, %v1438_v11, 0.0  ;;  %v570_v39 = vsel %vm559_vm5, %v1442_v12, 0.0 }
  0x5d   : > { %911 = vst [vmem:[%s1420_s27 + $0xa8] sm:$0xff] %v471_v0  ;;  %v945_v40 = vsel %vm558_vm4, 1.0, %v1273_v3  ;;  %v564_v41 = vadd.f32 %v563_v37, %v562_v36  ;;  %v571_v42 = vadd.f32 %v570_v39, %v569_v38  ;;  %v946_v43 = vsel %vm559_vm5, 1.0, %v1273_v3 }
  0x5e   : > { %915 = vst [vmem:[%s1420_s27 + $0x128] sm:$0xff] %v480_v4  ;;  %v580_v44 = vadd.f32 %v946_v43, %v945_v40  ;;  %vm583_vm6 = vcmp.ge.f32.partialorder %v1434_v8, 0.6666667  ;;  %vm584_vm7 = vcmp.ge.f32.partialorder %v1436_v9, 0.6666667 }
  0x5f   : > { %917 = vst [vmem:[%s1420_s27 + $0x30] sm:$0xff] %v489_v14  ;;  %v587_v45 = vsel %vm583_vm6, %v1434_v8, 0.0  ;;  %v588_v46 = vsel %vm584_vm7, %v1436_v9, 0.0  ;;  %v594_v48 = vsel %vm583_vm6, %v1438_v11, 0.0  ;;  %v595_v49 = vsel %vm584_vm7, %v1442_v12, 0.0 }
  0x60   : > { %919 = vst [vmem:[%s1420_s27 + $0xb0] sm:$0xff] %v496_v15  ;;  %v589_v47 = vadd.f32 %v588_v46, %v587_v45  ;;  %v596_v50 = vadd.f32 %v595_v49, %v594_v48  ;;  %v953_v51 = vsel %vm583_vm6, 1.0, %v1273_v3  ;;  %v954_v52 = vsel %vm584_vm7, 1.0, %v1273_v3 }
  0x61   : > { %923 = vst [vmem:[%s1420_s27 + $0x130] sm:$0xff] %v505_v17  ;;  %vm608_vm8 = vcmp.ge.f32.partialorder %v1434_v8, 0.73333335  ;;  %v605_v53 = vadd.f32 %v954_v52, %v953_v51  ;;  %vm609_vm9 = vcmp.ge.f32.partialorder %v1436_v9, 0.73333335 }
  0x62   : > { %925 = vst [vmem:[%s1420_s27 + $0x38] sm:$0xff] %v514_v20  ;;  %v612_v54 = vsel %vm608_vm8, %v1434_v8, 0.0  ;;  %v613_v55 = vsel %vm609_vm9, %v1436_v9, 0.0  ;;  %v619_v56 = vsel %vm608_vm8, %v1438_v11, 0.0  ;;  %v620_v57 = vsel %vm609_vm9, %v1442_v12, 0.0 }
  0x63   : > { %927 = vst [vmem:[%s1420_s27 + $0xb8] sm:$0xff] %v521_v23  ;;  %v614_v58 = vadd.f32 %v613_v55, %v612_v54  ;;  %v621_v59 = vadd.f32 %v620_v57, %v619_v56  ;;  %v961_v60 = vsel %vm608_vm8, 1.0, %v1273_v3  ;;  %v962_v61 = vsel %vm609_vm9, 1.0, %v1273_v3 }
  0x64   : > { %931 = vst [vmem:[%s1420_s27 + $0x138] sm:$0xff] %v530_v26  ;;  %vm633_vm10 = vcmp.ge.f32.partialorder %v1434_v8, 0.8  ;;  %vm634_vm11 = vcmp.ge.f32.partialorder %v1436_v9, 0.8  ;;  %v630_v62 = vadd.f32 %v962_v61, %v961_v60 }
  0x65   : > { %933 = vst [vmem:[%s1420_s27 + $0x40] sm:$0xff] %v539_v31  ;;  %v637_v63 = vsel %vm633_vm10, %v1434_v8, 0.0  ;;  %v638_v0 = vsel %vm634_vm11, %v1436_v9, 0.0  ;;  %v644_v1 = vsel %vm633_vm10, %v1438_v11, 0.0  ;;  %v645_v2 = vsel %vm634_vm11, %v1442_v12, 0.0 }
  0x66   : > { %935 = vst [vmem:[%s1420_s27 + $0xc0] sm:$0xff] %v546_v32  ;;  %v969_v4 = vsel %vm633_vm10, 1.0, %v1273_v3  ;;  %v639_v5 = vadd.f32 %v638_v0, %v637_v63  ;;  %v646_v6 = vadd.f32 %v645_v2, %v644_v1  ;;  %v970_v7 = vsel %vm634_vm11, 1.0, %v1273_v3 }
  0x67   : > { %939 = vst [vmem:[%s1420_s27 + $0x140] sm:$0xff] %v555_v35  ;;  %v655_v10 = vadd.f32 %v970_v7, %v969_v4  ;;  %vm658_vm12 = vcmp.ge.f32.partialorder %v1434_v8, 0.8666667  ;;  %vm659_vm13 = vcmp.ge.f32.partialorder %v1436_v9, 0.8666667 }
  0x68   : > { %941 = vst [vmem:[%s1420_s27 + $0x48] sm:$0xff] %v564_v41  ;;  %v662_v13 = vsel %vm658_vm12, %v1434_v8, 0.0  ;;  %v663_v14 = vsel %vm659_vm13, %v1436_v9, 0.0  ;;  %v669_v16 = vsel %vm658_vm12, %v1438_v11, 0.0  ;;  %v670_v17 = vsel %vm659_vm13, %v1442_v12, 0.0 }
  0x69   : > { %943 = vst [vmem:[%s1420_s27 + $0xc8] sm:$0xff] %v571_v42  ;;  %v664_v15 = vadd.f32 %v663_v14, %v662_v13  ;;  %v671_v18 = vadd.f32 %v670_v17, %v669_v16  ;;  %v977_v19 = vsel %vm658_vm12, 1.0, %v1273_v3  ;;  %v978_v20 = vsel %vm659_vm13, 1.0, %v1273_v3 }
  0x6a   : > { %947 = vst [vmem:[%s1420_s27 + $0x148] sm:$0xff] %v580_v44  ;;  %vm683_vm14 = vcmp.ge.f32.partialorder %v1434_v8, 0.93333334  ;;  %v680_v21 = vadd.f32 %v978_v20, %v977_v19  ;;  %vm684_vm15 = vcmp.ge.f32.partialorder %v1436_v9, 0.93333334 }
  0x6b   : > { %949 = vst [vmem:[%s1420_s27 + $0x50] sm:$0xff] %v589_v47  ;;  %v687_v22 = vsel %vm683_vm14, %v1434_v8, 0.0  ;;  %v688_v23 = vsel %vm684_vm15, %v1436_v9, 0.0  ;;  %v694_v24 = vsel %vm683_vm14, %v1438_v11, 0.0  ;;  %v695_v25 = vsel %vm684_vm15, %v1442_v12, 0.0 }
  0x6c   : > { %951 = vst [vmem:[%s1420_s27 + $0xd0] sm:$0xff] %v596_v50  ;;  %v689_v26 = vadd.f32 %v688_v23, %v687_v22  ;;  %v696_v27 = vadd.f32 %v695_v25, %v694_v24  ;;  %v985_v28 = vsel %vm683_vm14, 1.0, %v1273_v3  ;;  %v986_v29 = vsel %vm684_vm15, 1.0, %v1273_v3 }
  0x6d   : > { %955 = vst [vmem:[%s1420_s27 + $0x150] sm:$0xff] %v605_v53  ;;  %vm708_vm0 = vcmp.ge.f32.partialorder %v1434_v8, 1.01  ;;  %vm709_vm1 = vcmp.ge.f32.partialorder %v1436_v9, 1.01  ;;  %v705_v30 = vadd.f32 %v986_v29, %v985_v28 }
  0x6e   : > { %957 = vst [vmem:[%s1420_s27 + $0x58] sm:$0xff] %v614_v58  ;;  %v712_v31 = vsel %vm708_vm0, %v1434_v8, 0.0  ;;  %v713_v32 = vsel %vm709_vm1, %v1436_v9, 0.0  ;;  %v719_v33 = vsel %vm708_vm0, %v1438_v11, 0.0  ;;  %v720_v34 = vsel %vm709_vm1, %v1442_v12, 0.0 }
  0x6f   : > { %959 = vst [vmem:[%s1420_s27 + $0xd8] sm:$0xff] %v621_v59  ;;  %v993_v35 = vsel %vm708_vm0, 1.0, %v1273_v3  ;;  %v714_v36 = vadd.f32 %v713_v32, %v712_v31  ;;  %v721_v37 = vadd.f32 %v720_v34, %v719_v33  ;;  %v994_v8 = vsel %vm709_vm1, 1.0, %v1273_v3 }
  0x70   : > { %963 = vst [vmem:[%s1420_s27 + $0x158] sm:$0xff] %v630_v62  ;;  %v730_v38 = vadd.f32 %v994_v8, %v993_v35 }
  0x71   : > { %965 = vst [vmem:[%s1420_s27 + $0x60] sm:$0xff] %v639_v5 }
  0x72   : > { %967 = vst [vmem:[%s1420_s27 + $0xe0] sm:$0xff] %v646_v6 }
  0x73   : > { %971 = vst [vmem:[%s1420_s27 + $0x160] sm:$0xff] %v655_v10 }
  0x74   : > { %973 = vst [vmem:[%s1420_s27 + $0x68] sm:$0xff] %v664_v15 }
  0x75   : > { %975 = vst [vmem:[%s1420_s27 + $0xe8] sm:$0xff] %v671_v18 }
  0x76   : > { %979 = vst [vmem:[%s1420_s27 + $0x168] sm:$0xff] %v680_v21 }
  0x77   : > { %981 = vst [vmem:[%s1420_s27 + $0x70] sm:$0xff] %v689_v26 }
  0x78   : > { %983 = vst [vmem:[%s1420_s27 + $0xf0] sm:$0xff] %v696_v27 }
  0x79   : > { %987 = vst [vmem:[%s1420_s27 + $0x170] sm:$0xff] %v705_v30 }
  0x7a   : > { %989 = vst [vmem:[%s1420_s27 + $0x78] sm:$0xff] %v714_v36 }
  0x7b   : > { %991 = vst [vmem:[%s1420_s27 + $0xf8] sm:$0xff] %v721_v37 }
  0x7c   : > { %995 = vst [vmem:[%s1420_s27 + $0x178] sm:$0xff] %v730_v38 }
  0x7d   : > { %1187 = shalt.err (!%p1184_p7)
}
  0x7e   : > { %s1274_s4 = smov 128   ;;  %s1275_s18 = smov 8  }
  0x7f   : > { %1008 = dma.vmem_to_hbm [thread:$0]  (%p1355_p12), %s747_s29, 8192, %s749_s3, %s734_s7, %s1274_s4, %s1274_s4, %s1275_s18  }
  0x80 PF: > { %s763_s20 = sand.u32 1, %s1239_s9   ;;  %p1018_p9 = pnand %p856_p13, %p1360_p0 }
  0x81   : > { %s764_s27 = scalar_lea.sflag [#allocation4], %s763_s20 }
  0x82   : > { %p1019_p10 = pneg %p1018_p9 }
  0x84   : > { %1233 = dma.done.wait (%p1019_p10), %s764_s27, 8192  }
  0x85   : > { %1235 = vsyncadd (%p1019_p10), %s764_s27, 4294959104  ;;  %s21_s16 = sadd.s32 1, %s1267_s16   ;;  %s1699_s9 = smov %s1243_s10 }
  0x86   : > { %p18_p3 = scmp.ge.s32.totalorder %s21_s16, 4   ;;  %s1700_s10 = smov %s1247_s11 }
  0x87   : > { %s1701_s11 = smov %s1349_s24  ;;  %s1702_s12 = smov %s1255_s13 }
  0x88   : > { %s1680_s13 = smov 0   ;;  %s1703_s14 = smov %s1263_s15 }
  0x89   : > { %s1704_s15 = smov %s1706_s19  ;;  %20 = sbr.rel (!%p18_p3) target bundleno = 9 (0x9), region = 138 }
  0x8e   :  { %770 = vsyncpa [#allocation3], 1 }
  0x8f   :  { %772 = vsyncpa [#allocation3 + $0x1], 1 }
  0x90   :  { %773 = vsyncpa [#allocation6], 1 }
  0x91   :  { %775 = vsyncpa [#allocation6 + $0x1], 1 }
  0x92   :  { %776 = vsyncpa [#allocation4], 1 }
  0x93   :  { %778 = vsyncpa [#allocation4 + $0x1], 1 }

</bundles_post_ra>
